<compile_context>
chip_gen: v7x
topology: tpu7x:2x2x1
jax: 0.10.0
libtpu: 0.0.40
codegen_flags: <defaults>
</compile_context>

<pallas_src>
import math
import functools

import jax
import jax.numpy as jnp
from jax.experimental import pallas as pl
from jax.experimental.pallas import tpu as pltpu


# --------------------------------------------------------------------------
# Kernel
# --------------------------------------------------------------------------
def _layer_norm(x, gamma, beta, eps=1e-6):
    # Matches the module's LayerNorm: gamma*(x-mean)/(std+eps)+beta with
    # std = sqrt(mean((x-mean)^2)) (unbiased=False; eps added to std, not var).
    mean = jnp.mean(x, axis=-1, keepdims=True)
    var = jnp.mean((x - mean) ** 2, axis=-1, keepdims=True)
    inv = pl.reciprocal(jnp.sqrt(var) + eps, approx=True)   # EUP, not a VPU divide
    return gamma * (x - mean) * inv + beta


def encoder_stack_kernel(x_ref, wqkv_ref, bqkv_ref, wo_ref, bo_ref,
                         g1_ref, be1_ref, w1_ref, b1_ref, w2_ref, b2_ref,
                         g2_ref, be2_ref, o_ref,
                         *, n_layers, heads, d_k, nb, seq):
    """Full encoder stack applied to one (nb*seq, D) row block.

    grid = (row_blocks,); all stacked per-layer weights live untiled in VMEM
    and the layer loop is statically unrolled, so the residual stream `x`
    stays in f32 registers for the whole stack.
    """
    D = heads * d_k
    rows = nb * seq
    x = x_ref[...].astype(jnp.float32)                        # (rows, D)

    for l in range(n_layers):                                 # static unroll
        # ---- sublayer 1: x + MultiHeadAttention(LayerNorm(x)) ----
        ln1 = _layer_norm(x, g1_ref[l], be1_ref[l])
        # Fused QKV projection; 1/sqrt(d_k) already folded into q cols host-side.
        qkv = jnp.dot(ln1, wqkv_ref[l],
                      preferred_element_type=jnp.float32) + bqkv_ref[l]   # (rows, 3D)

        # Gather every head into one (heads*nb, seq, d_k) batch (leading-axis
        # concat of lane slices), then one batched scores/softmax/context.
        def head_batch(col0):
            parts = [qkv[:, col0 + h * d_k: col0 + (h + 1) * d_k]
                     .reshape(nb, seq, d_k) for h in range(heads)]
            return jnp.concatenate(parts, axis=0)             # (heads*nb, seq, d_k)

        qh = head_batch(0)
        kh = head_batch(D)
        vh = head_batch(2 * D)

        s = jnp.einsum('bqd,bkd->bqk', qh, kh,
                       preferred_element_type=jnp.float32)    # (heads*nb, seq, seq)
        s = s - jnp.max(s, axis=-1, keepdims=True)
        p = jnp.exp(s)
        p = p * pl.reciprocal(jnp.sum(p, axis=-1, keepdims=True), approx=True)
        ctx = jnp.einsum('bqk,bkd->bqd', p, vh,
                         preferred_element_type=jnp.float32)  # (heads*nb, seq, d_k)

        # Output projection with head placement folded into wo
        # (wo_ref is (L, heads, d_k, D)): attn = sum_h ctx_h @ wo[l, h] + bo.
        attn = bo_ref[l]                                      # (1, D), broadcasts
        for h in range(heads):
            ctx_h = ctx[h * nb:(h + 1) * nb].reshape(rows, d_k)
            attn = attn + jnp.dot(ctx_h, wo_ref[l, h],
                                  preferred_element_type=jnp.float32)
        x = x + attn                                          # residual

        # ---- sublayer 2: x + FFN(LayerNorm(x)) ----
        ln2 = _layer_norm(x, g2_ref[l], be2_ref[l])
        hdn = jnp.dot(ln2, w1_ref[l],
                      preferred_element_type=jnp.float32) + b1_ref[l]
        hdn = jnp.maximum(hdn, 0.0)                           # ReLU (clamp min=0)
        ff = jnp.dot(hdn, w2_ref[l],
                     preferred_element_type=jnp.float32) + b2_ref[l]
        x = x + ff                                            # residual

    o_ref[...] = x.astype(o_ref.dtype)


# --------------------------------------------------------------------------
# Wrapper: one pallas_call for the whole stack
# --------------------------------------------------------------------------
def encoder_pallas(x, layer_params, heads, *, row_blocks=1):
    """x: (B, S, D); layer_params: list of per-layer dicts.

    row_blocks splits B*S rows into blocks along a 'parallel' grid axis: keep
    row_blocks=1 on single-TC v5e/v6e; use row_blocks=B on v7x (2 TensorCores).
    """
    B, S, D = x.shape
    L = len(layer_params)
    d_k = D // heads
    assert heads * d_k == D
    assert B % row_blocks == 0
    d_ff = layer_params[0]["w1"].shape[1]
    rows = B * S
    rb = rows // row_blocks            # rows per block
    nb = B // row_blocks               # batch elements per block

    # --- host-side weight prep: stack layers, fuse QKV, fold score scale,
    #     reshape wo per head so the kernel never re-interleaves head columns.
    scale = 1.0 / math.sqrt(d_k)
    wqkv = jnp.stack([jnp.concatenate([p["wq"] * scale, p["wk"], p["wv"]],
                                      axis=1) for p in layer_params])      # (L, D, 3D)
    bqkv = jnp.stack([jnp.concatenate([p["bq"] * scale, p["bk"], p["bv"]],
                                      axis=1) for p in layer_params])      # (L, 1, 3D)
    wo = jnp.stack([p["wo"].reshape(heads, d_k, D)
                    for p in layer_params])                                # (L, H, d_k, D)
    bo = jnp.stack([p["bo"] for p in layer_params])                        # (L, 1, D)
    g1 = jnp.stack([p["g1"] for p in layer_params])
    be1 = jnp.stack([p["be1"] for p in layer_params])
    w1 = jnp.stack([p["w1"] for p in layer_params])                        # (L, D, d_ff)
    b1 = jnp.stack([p["b1"] for p in layer_params])                        # (L, 1, d_ff)
    w2 = jnp.stack([p["w2"] for p in layer_params])                        # (L, d_ff, D)
    b2 = jnp.stack([p["b2"] for p in layer_params])                        # (L, 1, D)
    g2 = jnp.stack([p["g2"] for p in layer_params])
    be2 = jnp.stack([p["be2"] for p in layer_params])

    x2d = x.reshape(rows, D)

    def full_spec(arr):
        # Whole (stacked) weight array resident in VMEM; constant block index
        # so it is DMA'd once and never re-fetched across row blocks.
        zeros = (0,) * arr.ndim
        return pl.BlockSpec(arr.shape, lambda b: zeros)

    weights = [wqkv, bqkv, wo, bo, g1, be1, w1, b1, w2, b2, g2, be2]
    in_specs = ([pl.BlockSpec((rb, D), lambda b: (b, 0))]
                + [full_spec(w) for w in weights])
    out_spec = pl.BlockSpec((rb, D), lambda b: (b, 0))

    kernel = functools.partial(encoder_stack_kernel, n_layers=L,
                               heads=heads, d_k=d_k, nb=nb, seq=S)

    out2d = pl.pallas_call(
        kernel,
        out_shape=jax.ShapeDtypeStruct((rows, D), x.dtype),
        grid_spec=pltpu.PrefetchScalarGridSpec(
            num_scalar_prefetch=0,
            grid=(row_blocks,),                     # layer loop is inside the body
            in_specs=in_specs,
            out_specs=out_spec,
        ),
        input_output_aliases={0: 0},                # donate x2d buffer for the output
        compiler_params=pltpu.CompilerParams(
            dimension_semantics=("parallel",)),
    )(x2d, *weights)

    return out2d.reshape(B, S, D)


# --------------------------------------------------------------------------
# Pure-JAX reference (same math, exact divides) for verification
# --------------------------------------------------------------------------
def encoder_block_ref(x, p, heads):
    B, S, D = x.shape
    d_k = D // heads

    def ln(y, g, b):
        m = jnp.mean(y, axis=-1, keepdims=True)
        s = jnp.sqrt(jnp.mean((y - m) ** 2, axis=-1, keepdims=True))
        return g * (y - m) / (s + 1e-6) + b

    ln1 = ln(x, p["g1"][0], p["be1"][0])
    q = ln1 @ p["wq"] + p["bq"][0]
    k = ln1 @ p["wk"] + p["bk"][0]
    v = ln1 @ p["wv"] + p["bv"][0]
    qh = q.reshape(B, S, heads, d_k).transpose(0, 2, 1, 3)
    kh = k.reshape(B, S, heads, d_k).transpose(0, 2, 1, 3)
    vh = v.reshape(B, S, heads, d_k).transpose(0, 2, 1, 3)
    scores = jnp.einsum("bhqd,bhkd->bhqk", qh, kh) / math.sqrt(d_k)
    pa = jax.nn.softmax(scores, axis=-1)
    ah = jnp.einsum("bhqk,bhkd->bhqd", pa, vh)
    a = ah.transpose(0, 2, 1, 3).reshape(B, S, D) @ p["wo"] + p["bo"][0]
    x1 = x + a
    ln2 = ln(x1, p["g2"][0], p["be2"][0])
    h = jnp.maximum(ln2 @ p["w1"] + p["b1"][0], 0.0)
    return x1 + (h @ p["w2"] + p["b2"][0])


def encoder_ref(x, layer_params, heads):
    for p in layer_params:
        x = encoder_block_ref(x, p, heads)
    return x


# --------------------------------------------------------------------------
# Deterministic parameter init
# --------------------------------------------------------------------------
def init_layer_params(key, d_model, d_ff):
    ks = jax.random.split(key, 6)
    scale = 0.05

    def lin(k, fi, fo):
        kw, kb = jax.random.split(k)
        w = jax.random.normal(kw, (fi, fo), jnp.float32) * scale
        b = jax.random.normal(kb, (1, fo), jnp.float32) * scale
        return w, b

    wq, bq = lin(ks[0], d_model, d_model)
    wk, bk = lin(ks[1], d_model, d_model)
    wv, bv = lin(ks[2], d_model, d_model)
    wo, bo = lin(ks[3], d_model, d_model)
    w1, b1 = lin(ks[4], d_model, d_ff)
    w2, b2 = lin(ks[5], d_ff, d_model)
    ones = jnp.ones((1, d_model), jnp.float32)
    zeros = jnp.zeros((1, d_model), jnp.float32)
    return dict(wq=wq, bq=bq, wk=wk, bk=bk, wv=wv, bv=bv, wo=wo, bo=bo,
                g1=ones, be1=zeros, w1=w1, b1=b1, w2=w2, b2=b2,
                g2=ones, be2=zeros)


# --------------------------------------------------------------------------
if __name__ == "__main__":
    # Small shapes consistent with the module (d_model=32, heads=4, d_ff=64,
    # 2 encoder layers, batch=2, seq=8).
    B, S, D, H, D_FF, N_LAYERS = 2, 8, 32, 4, 64, 2

    key = jax.random.PRNGKey(0)
    k_x, *k_layers = jax.random.split(key, N_LAYERS + 1)

    x = jax.random.normal(k_x, (B, S, D), jnp.float32)
    layer_params = [init_layer_params(k, D, D_FF) for k in k_layers]

    out = encoder_pallas(x, layer_params, H)     # row_blocks=B on v7x for 2-TC split
    out = jax.block_until_ready(out)

    ref = encoder_ref(x, layer_params, H)
    assert out.shape == (B, S, D)
    # Tolerance loosened vs the exact-divide reference because the kernel uses
    # the approximate EUP reciprocal for the LN and softmax normalizations.
    assert jnp.allclose(out, ref, atol=2e-2, rtol=2e-2), "mismatch vs reference"

    print("KERNEL_OK")
</pallas_src>

<mosaic_0001>
module attributes {stable_mosaic.version = 11 : i64} {
  func.func @encoder_stack_kernel(%arg0: i32, %arg1: memref<16x32xf32, #tpu.memory_space<vmem>>, %arg2: memref<2x32x96xf32, #tpu.memory_space<vmem>>, %arg3: memref<2x1x96xf32, #tpu.memory_space<vmem>>, %arg4: memref<2x4x8x32xf32, #tpu.memory_space<vmem>>, %arg5: memref<2x1x32xf32, #tpu.memory_space<vmem>>, %arg6: memref<2x1x32xf32, #tpu.memory_space<vmem>>, %arg7: memref<2x1x32xf32, #tpu.memory_space<vmem>>, %arg8: memref<2x32x64xf32, #tpu.memory_space<vmem>>, %arg9: memref<2x1x64xf32, #tpu.memory_space<vmem>>, %arg10: memref<2x64x32xf32, #tpu.memory_space<vmem>>, %arg11: memref<2x1x32xf32, #tpu.memory_space<vmem>>, %arg12: memref<2x1x32xf32, #tpu.memory_space<vmem>>, %arg13: memref<2x1x32xf32, #tpu.memory_space<vmem>>, %arg14: memref<16x32xf32, #tpu.memory_space<vmem>>) attributes {dimension_semantics = [#tpu.dimension_semantics<parallel>], iteration_bounds = array<i64: 1>, scalar_prefetch = 0 : i64, scratch_operands = 0 : i64, tpu.core_type = #tpu.core_type<tc>, window_params = [{transform_indices = @transform_0, window_bounds = array<i64: 16, 32>}, {pipeline_mode = #tpu.pipeline_mode<synchronous>, transform_indices = @transform_1, window_bounds = array<i64: 2, 32, 96>}, {pipeline_mode = #tpu.pipeline_mode<synchronous>, transform_indices = @transform_2, window_bounds = array<i64: 2, 1, 96>}, {pipeline_mode = #tpu.pipeline_mode<synchronous>, transform_indices = @transform_3, window_bounds = array<i64: 2, 4, 8, 32>}, {pipeline_mode = #tpu.pipeline_mode<synchronous>, transform_indices = @transform_4, window_bounds = array<i64: 2, 1, 32>}, {pipeline_mode = #tpu.pipeline_mode<synchronous>, transform_indices = @transform_5, window_bounds = array<i64: 2, 1, 32>}, {pipeline_mode = #tpu.pipeline_mode<synchronous>, transform_indices = @transform_6, window_bounds = array<i64: 2, 1, 32>}, {pipeline_mode = #tpu.pipeline_mode<synchronous>, transform_indices = @transform_7, window_bounds = array<i64: 2, 32, 64>}, {pipeline_mode = #tpu.pipeline_mode<synchronous>, transform_indices = @transform_8, window_bounds = array<i64: 2, 1, 64>}, {pipeline_mode = #tpu.pipeline_mode<synchronous>, transform_indices = @transform_9, window_bounds = array<i64: 2, 64, 32>}, {pipeline_mode = #tpu.pipeline_mode<synchronous>, transform_indices = @transform_10, window_bounds = array<i64: 2, 1, 32>}, {pipeline_mode = #tpu.pipeline_mode<synchronous>, transform_indices = @transform_11, window_bounds = array<i64: 2, 1, 32>}, {pipeline_mode = #tpu.pipeline_mode<synchronous>, transform_indices = @transform_12, window_bounds = array<i64: 2, 1, 32>}, {transform_indices = @transform_13, window_bounds = array<i64: 16, 32>}]} {
    %c0 = arith.constant 0 : index
    %c0_0 = arith.constant 0 : index
    %0 = vector.load %arg1[%c0, %c0_0] : memref<16x32xf32, #tpu.memory_space<vmem>>, vector<16x32xf32>
    %c0_1 = arith.constant 0 : index
    %c0_2 = arith.constant 0 : index
    %c0_3 = arith.constant 0 : index
    %1 = vector.load %arg6[%c0_1, %c0_2, %c0_3] : memref<2x1x32xf32, #tpu.memory_space<vmem>>, vector<1x1x32xf32>
    %2 = vector.shape_cast %1 : vector<1x1x32xf32> to vector<1x32xf32>
    %c0_4 = arith.constant 0 : index
    %c0_5 = arith.constant 0 : index
    %c0_6 = arith.constant 0 : index
    %3 = vector.load %arg7[%c0_4, %c0_5, %c0_6] : memref<2x1x32xf32, #tpu.memory_space<vmem>>, vector<1x1x32xf32>
    %4 = vector.shape_cast %3 : vector<1x1x32xf32> to vector<1x32xf32>
    %cst = arith.constant dense<0.000000e+00> : vector<16xf32>
    %5 = vector.multi_reduction <add>, %0, %cst [1] : vector<16x32xf32> to vector<16xf32>
    %6 = vector.shape_cast %5 : vector<16xf32> to vector<16x1xf32>
    %cst_7 = arith.constant 3.200000e+01 : f32
    %7 = vector.broadcast %cst_7 : f32 to vector<16x1xf32>
    %8 = arith.divf %6, %7 : vector<16x1xf32>
    %9 = vector.broadcast %8 : vector<16x1xf32> to vector<16x32xf32>
    %10 = arith.subf %0, %9 : vector<16x32xf32>
    %11 = arith.mulf %10, %10 : vector<16x32xf32>
    %cst_8 = arith.constant dense<0.000000e+00> : vector<16xf32>
    %12 = vector.multi_reduction <add>, %11, %cst_8 [1] : vector<16x32xf32> to vector<16xf32>
    %13 = vector.shape_cast %12 : vector<16xf32> to vector<16x1xf32>
    %cst_9 = arith.constant 3.200000e+01 : f32
    %14 = vector.broadcast %cst_9 : f32 to vector<16x1xf32>
    %15 = arith.divf %13, %14 : vector<16x1xf32>
    %16 = math.sqrt %15 : vector<16x1xf32>
    %cst_10 = arith.constant 9.99999997E-7 : f32
    %17 = vector.broadcast %cst_10 : f32 to vector<16x1xf32>
    %18 = arith.addf %16, %17 : vector<16x1xf32>
    %19 = tpu.reciprocal %18 {approx = true} : vector<16x1xf32> -> vector<16x1xf32>
    %20 = vector.broadcast %8 : vector<16x1xf32> to vector<16x32xf32>
    %21 = arith.subf %0, %20 : vector<16x32xf32>
    %22 = vector.broadcast %2 : vector<1x32xf32> to vector<16x32xf32>
    %23 = arith.mulf %22, %21 : vector<16x32xf32>
    %24 = vector.broadcast %19 : vector<16x1xf32> to vector<16x32xf32>
    %25 = arith.mulf %23, %24 : vector<16x32xf32>
    %26 = vector.broadcast %4 : vector<1x32xf32> to vector<16x32xf32>
    %27 = arith.addf %25, %26 : vector<16x32xf32>
    %c0_11 = arith.constant 0 : index
    %c0_12 = arith.constant 0 : index
    %c0_13 = arith.constant 0 : index
    %28 = vector.load %arg2[%c0_11, %c0_12, %c0_13] : memref<2x32x96xf32, #tpu.memory_space<vmem>>, vector<1x32x96xf32>
    %29 = vector.shape_cast %28 : vector<1x32x96xf32> to vector<32x96xf32>
    %cst_14 = arith.constant dense<0.000000e+00> : vector<16x96xf32>
    %30 = tpu.matmul %27, %29, %cst_14 {dimension_numbers = #tpu.dot_dimension_numbers<[1], [0], [0], [1], [0, 0, 1, 1], [], []>} : vector<16x32xf32>, vector<32x96xf32>, vector<16x96xf32> -> vector<16x96xf32>
    %c0_15 = arith.constant 0 : index
    %c0_16 = arith.constant 0 : index
    %c0_17 = arith.constant 0 : index
    %31 = vector.load %arg3[%c0_15, %c0_16, %c0_17] : memref<2x1x96xf32, #tpu.memory_space<vmem>>, vector<1x1x96xf32>
    %32 = vector.shape_cast %31 : vector<1x1x96xf32> to vector<1x96xf32>
    %33 = vector.broadcast %32 : vector<1x96xf32> to vector<16x96xf32>
    %34 = arith.addf %30, %33 : vector<16x96xf32>
    %35 = vector.extract_strided_slice %34 {offsets = [0, 0], sizes = [16, 8], strides = [1, 1]} : vector<16x96xf32> to vector<16x8xf32>
    %36 = vector.shape_cast %35 : vector<16x8xf32> to vector<2x8x8xf32>
    %37 = vector.extract_strided_slice %34 {offsets = [0, 8], sizes = [16, 8], strides = [1, 1]} : vector<16x96xf32> to vector<16x8xf32>
    %38 = vector.shape_cast %37 : vector<16x8xf32> to vector<2x8x8xf32>
    %39 = vector.extract_strided_slice %34 {offsets = [0, 16], sizes = [16, 8], strides = [1, 1]} : vector<16x96xf32> to vector<16x8xf32>
    %40 = vector.shape_cast %39 : vector<16x8xf32> to vector<2x8x8xf32>
    %41 = vector.extract_strided_slice %34 {offsets = [0, 24], sizes = [16, 8], strides = [1, 1]} : vector<16x96xf32> to vector<16x8xf32>
    %42 = vector.shape_cast %41 : vector<16x8xf32> to vector<2x8x8xf32>
    %43 = tpu.concatenate %36, %38, %40, %42 in 0 : vector<2x8x8xf32>, vector<2x8x8xf32>, vector<2x8x8xf32>, vector<2x8x8xf32> -> vector<8x8x8xf32>
    %44 = vector.extract_strided_slice %34 {offsets = [0, 32], sizes = [16, 8], strides = [1, 1]} : vector<16x96xf32> to vector<16x8xf32>
    %45 = vector.shape_cast %44 : vector<16x8xf32> to vector<2x8x8xf32>
    %46 = vector.extract_strided_slice %34 {offsets = [0, 40], sizes = [16, 8], strides = [1, 1]} : vector<16x96xf32> to vector<16x8xf32>
    %47 = vector.shape_cast %46 : vector<16x8xf32> to vector<2x8x8xf32>
    %48 = vector.extract_strided_slice %34 {offsets = [0, 48], sizes = [16, 8], strides = [1, 1]} : vector<16x96xf32> to vector<16x8xf32>
    %49 = vector.shape_cast %48 : vector<16x8xf32> to vector<2x8x8xf32>
    %50 = vector.extract_strided_slice %34 {offsets = [0, 56], sizes = [16, 8], strides = [1, 1]} : vector<16x96xf32> to vector<16x8xf32>
    %51 = vector.shape_cast %50 : vector<16x8xf32> to vector<2x8x8xf32>
    %52 = tpu.concatenate %45, %47, %49, %51 in 0 : vector<2x8x8xf32>, vector<2x8x8xf32>, vector<2x8x8xf32>, vector<2x8x8xf32> -> vector<8x8x8xf32>
    %53 = vector.extract_strided_slice %34 {offsets = [0, 64], sizes = [16, 8], strides = [1, 1]} : vector<16x96xf32> to vector<16x8xf32>
    %54 = vector.shape_cast %53 : vector<16x8xf32> to vector<2x8x8xf32>
    %55 = vector.extract_strided_slice %34 {offsets = [0, 72], sizes = [16, 8], strides = [1, 1]} : vector<16x96xf32> to vector<16x8xf32>
    %56 = vector.shape_cast %55 : vector<16x8xf32> to vector<2x8x8xf32>
    %57 = vector.extract_strided_slice %34 {offsets = [0, 80], sizes = [16, 8], strides = [1, 1]} : vector<16x96xf32> to vector<16x8xf32>
    %58 = vector.shape_cast %57 : vector<16x8xf32> to vector<2x8x8xf32>
    %59 = vector.extract_strided_slice %34 {offsets = [0, 88], sizes = [16, 8], strides = [1, 1]} : vector<16x96xf32> to vector<16x8xf32>
    %60 = vector.shape_cast %59 : vector<16x8xf32> to vector<2x8x8xf32>
    %61 = tpu.concatenate %54, %56, %58, %60 in 0 : vector<2x8x8xf32>, vector<2x8x8xf32>, vector<2x8x8xf32>, vector<2x8x8xf32> -> vector<8x8x8xf32>
    "tpu.trace_start"() <{level = 10 : i32, message = "bqd,bkd->bqk"}> : () -> ()
    %cst_18 = arith.constant dense<0.000000e+00> : vector<8x8x8xf32>
    %62 = tpu.matmul %43, %52, %cst_18 {dimension_numbers = #tpu.dot_dimension_numbers<[2], [2], [1], [1], [0, 0, 0, 1, 1, 1], [0], [0]>} : vector<8x8x8xf32>, vector<8x8x8xf32>, vector<8x8x8xf32> -> vector<8x8x8xf32>
    "tpu.trace_stop"() : () -> ()
    %cst_19 = arith.constant dense<0xFF800000> : vector<8x8xf32>
    %63 = vector.multi_reduction <maximumf>, %62, %cst_19 [2] : vector<8x8x8xf32> to vector<8x8xf32>
    %64 = vector.shape_cast %63 : vector<8x8xf32> to vector<8x8x1xf32>
    %65 = vector.broadcast %64 : vector<8x8x1xf32> to vector<8x8x8xf32>
    %66 = arith.subf %62, %65 : vector<8x8x8xf32>
    %67 = math.exp %66 : vector<8x8x8xf32>
    %cst_20 = arith.constant dense<0.000000e+00> : vector<8x8xf32>
    %68 = vector.multi_reduction <add>, %67, %cst_20 [2] : vector<8x8x8xf32> to vector<8x8xf32>
    %69 = vector.shape_cast %68 : vector<8x8xf32> to vector<8x8x1xf32>
    %70 = tpu.reciprocal %69 {approx = true} : vector<8x8x1xf32> -> vector<8x8x1xf32>
    %71 = vector.broadcast %70 : vector<8x8x1xf32> to vector<8x8x8xf32>
    %72 = arith.mulf %67, %71 : vector<8x8x8xf32>
    "tpu.trace_start"() <{level = 10 : i32, message = "bqk,bkd->bqd"}> : () -> ()
    %cst_21 = arith.constant dense<0.000000e+00> : vector<8x8x8xf32>
    %73 = tpu.matmul %72, %61, %cst_21 {dimension_numbers = #tpu.dot_dimension_numbers<[2], [1], [1], [2], [0, 0, 0, 1, 1, 2], [0], [0]>} : vector<8x8x8xf32>, vector<8x8x8xf32>, vector<8x8x8xf32> -> vector<8x8x8xf32>
    "tpu.trace_stop"() : () -> ()
    %c0_22 = arith.constant 0 : index
    %c0_23 = arith.constant 0 : index
    %c0_24 = arith.constant 0 : index
    %74 = vector.load %arg5[%c0_22, %c0_23, %c0_24] : memref<2x1x32xf32, #tpu.memory_space<vmem>>, vector<1x1x32xf32>
    %75 = vector.shape_cast %74 : vector<1x1x32xf32> to vector<1x32xf32>
    %76 = vector.extract_strided_slice %73 {offsets = [0, 0, 0], sizes = [2, 8, 8], strides = [1, 1, 1]} : vector<8x8x8xf32> to vector<2x8x8xf32>
    %77 = vector.shape_cast %76 : vector<2x8x8xf32> to vector<16x8xf32>
    %c0_25 = arith.constant 0 : index
    %c0_26 = arith.constant 0 : index
    %c0_27 = arith.constant 0 : index
    %c0_28 = arith.constant 0 : index
    %78 = vector.load %arg4[%c0_25, %c0_26, %c0_27, %c0_28] : memref<2x4x8x32xf32, #tpu.memory_space<vmem>>, vector<1x1x8x32xf32>
    %79 = vector.shape_cast %78 : vector<1x1x8x32xf32> to vector<8x32xf32>
    %cst_29 = arith.constant dense<0.000000e+00> : vector<16x32xf32>
    %80 = tpu.matmul %77, %79, %cst_29 {dimension_numbers = #tpu.dot_dimension_numbers<[1], [0], [0], [1], [0, 0, 1, 1], [], []>} : vector<16x8xf32>, vector<8x32xf32>, vector<16x32xf32> -> vector<16x32xf32>
    %81 = vector.broadcast %75 : vector<1x32xf32> to vector<16x32xf32>
    %82 = arith.addf %81, %80 : vector<16x32xf32>
    %83 = vector.extract_strided_slice %73 {offsets = [2, 0, 0], sizes = [2, 8, 8], strides = [1, 1, 1]} : vector<8x8x8xf32> to vector<2x8x8xf32>
    %84 = vector.shape_cast %83 : vector<2x8x8xf32> to vector<16x8xf32>
    %c0_30 = arith.constant 0 : index
    %c1 = arith.constant 1 : index
    %c0_31 = arith.constant 0 : index
    %c0_32 = arith.constant 0 : index
    %85 = vector.load %arg4[%c0_30, %c1, %c0_31, %c0_32] : memref<2x4x8x32xf32, #tpu.memory_space<vmem>>, vector<1x1x8x32xf32>
    %86 = vector.shape_cast %85 : vector<1x1x8x32xf32> to vector<8x32xf32>
    %cst_33 = arith.constant dense<0.000000e+00> : vector<16x32xf32>
    %87 = tpu.matmul %84, %86, %cst_33 {dimension_numbers = #tpu.dot_dimension_numbers<[1], [0], [0], [1], [0, 0, 1, 1], [], []>} : vector<16x8xf32>, vector<8x32xf32>, vector<16x32xf32> -> vector<16x32xf32>
    %88 = arith.addf %82, %87 : vector<16x32xf32>
    %89 = vector.extract_strided_slice %73 {offsets = [4, 0, 0], sizes = [2, 8, 8], strides = [1, 1, 1]} : vector<8x8x8xf32> to vector<2x8x8xf32>
    %90 = vector.shape_cast %89 : vector<2x8x8xf32> to vector<16x8xf32>
    %c0_34 = arith.constant 0 : index
    %c2 = arith.constant 2 : index
    %c0_35 = arith.constant 0 : index
    %c0_36 = arith.constant 0 : index
    %91 = vector.load %arg4[%c0_34, %c2, %c0_35, %c0_36] : memref<2x4x8x32xf32, #tpu.memory_space<vmem>>, vector<1x1x8x32xf32>
    %92 = vector.shape_cast %91 : vector<1x1x8x32xf32> to vector<8x32xf32>
    %cst_37 = arith.constant dense<0.000000e+00> : vector<16x32xf32>
    %93 = tpu.matmul %90, %92, %cst_37 {dimension_numbers = #tpu.dot_dimension_numbers<[1], [0], [0], [1], [0, 0, 1, 1], [], []>} : vector<16x8xf32>, vector<8x32xf32>, vector<16x32xf32> -> vector<16x32xf32>
    %94 = arith.addf %88, %93 : vector<16x32xf32>
    %95 = vector.extract_strided_slice %73 {offsets = [6, 0, 0], sizes = [2, 8, 8], strides = [1, 1, 1]} : vector<8x8x8xf32> to vector<2x8x8xf32>
    %96 = vector.shape_cast %95 : vector<2x8x8xf32> to vector<16x8xf32>
    %c0_38 = arith.constant 0 : index
    %c3 = arith.constant 3 : index
    %c0_39 = arith.constant 0 : index
    %c0_40 = arith.constant 0 : index
    %97 = vector.load %arg4[%c0_38, %c3, %c0_39, %c0_40] : memref<2x4x8x32xf32, #tpu.memory_space<vmem>>, vector<1x1x8x32xf32>
    %98 = vector.shape_cast %97 : vector<1x1x8x32xf32> to vector<8x32xf32>
    %cst_41 = arith.constant dense<0.000000e+00> : vector<16x32xf32>
    %99 = tpu.matmul %96, %98, %cst_41 {dimension_numbers = #tpu.dot_dimension_numbers<[1], [0], [0], [1], [0, 0, 1, 1], [], []>} : vector<16x8xf32>, vector<8x32xf32>, vector<16x32xf32> -> vector<16x32xf32>
    %100 = arith.addf %94, %99 : vector<16x32xf32>
    %101 = arith.addf %0, %100 : vector<16x32xf32>
    %c0_42 = arith.constant 0 : index
    %c0_43 = arith.constant 0 : index
    %c0_44 = arith.constant 0 : index
    %102 = vector.load %arg12[%c0_42, %c0_43, %c0_44] : memref<2x1x32xf32, #tpu.memory_space<vmem>>, vector<1x1x32xf32>
    %103 = vector.shape_cast %102 : vector<1x1x32xf32> to vector<1x32xf32>
    %c0_45 = arith.constant 0 : index
    %c0_46 = arith.constant 0 : index
    %c0_47 = arith.constant 0 : index
    %104 = vector.load %arg13[%c0_45, %c0_46, %c0_47] : memref<2x1x32xf32, #tpu.memory_space<vmem>>, vector<1x1x32xf32>
    %105 = vector.shape_cast %104 : vector<1x1x32xf32> to vector<1x32xf32>
    %cst_48 = arith.constant dense<0.000000e+00> : vector<16xf32>
    %106 = vector.multi_reduction <add>, %101, %cst_48 [1] : vector<16x32xf32> to vector<16xf32>
    %107 = vector.shape_cast %106 : vector<16xf32> to vector<16x1xf32>
    %cst_49 = arith.constant 3.200000e+01 : f32
    %108 = vector.broadcast %cst_49 : f32 to vector<16x1xf32>
    %109 = arith.divf %107, %108 : vector<16x1xf32>
    %110 = vector.broadcast %109 : vector<16x1xf32> to vector<16x32xf32>
    %111 = arith.subf %101, %110 : vector<16x32xf32>
    %112 = arith.mulf %111, %111 : vector<16x32xf32>
    %cst_50 = arith.constant dense<0.000000e+00> : vector<16xf32>
    %113 = vector.multi_reduction <add>, %112, %cst_50 [1] : vector<16x32xf32> to vector<16xf32>
    %114 = vector.shape_cast %113 : vector<16xf32> to vector<16x1xf32>
    %cst_51 = arith.constant 3.200000e+01 : f32
    %115 = vector.broadcast %cst_51 : f32 to vector<16x1xf32>
    %116 = arith.divf %114, %115 : vector<16x1xf32>
    %117 = math.sqrt %116 : vector<16x1xf32>
    %cst_52 = arith.constant 9.99999997E-7 : f32
    %118 = vector.broadcast %cst_52 : f32 to vector<16x1xf32>
    %119 = arith.addf %117, %118 : vector<16x1xf32>
    %120 = tpu.reciprocal %119 {approx = true} : vector<16x1xf32> -> vector<16x1xf32>
    %121 = vector.broadcast %109 : vector<16x1xf32> to vector<16x32xf32>
    %122 = arith.subf %101, %121 : vector<16x32xf32>
    %123 = vector.broadcast %103 : vector<1x32xf32> to vector<16x32xf32>
    %124 = arith.mulf %123, %122 : vector<16x32xf32>
    %125 = vector.broadcast %120 : vector<16x1xf32> to vector<16x32xf32>
    %126 = arith.mulf %124, %125 : vector<16x32xf32>
    %127 = vector.broadcast %105 : vector<1x32xf32> to vector<16x32xf32>
    %128 = arith.addf %126, %127 : vector<16x32xf32>
    %c0_53 = arith.constant 0 : index
    %c0_54 = arith.constant 0 : index
    %c0_55 = arith.constant 0 : index
    %129 = vector.load %arg8[%c0_53, %c0_54, %c0_55] : memref<2x32x64xf32, #tpu.memory_space<vmem>>, vector<1x32x64xf32>
    %130 = vector.shape_cast %129 : vector<1x32x64xf32> to vector<32x64xf32>
    %cst_56 = arith.constant dense<0.000000e+00> : vector<16x64xf32>
    %131 = tpu.matmul %128, %130, %cst_56 {dimension_numbers = #tpu.dot_dimension_numbers<[1], [0], [0], [1], [0, 0, 1, 1], [], []>} : vector<16x32xf32>, vector<32x64xf32>, vector<16x64xf32> -> vector<16x64xf32>
    %c0_57 = arith.constant 0 : index
    %c0_58 = arith.constant 0 : index
    %c0_59 = arith.constant 0 : index
    %132 = vector.load %arg9[%c0_57, %c0_58, %c0_59] : memref<2x1x64xf32, #tpu.memory_space<vmem>>, vector<1x1x64xf32>
    %133 = vector.shape_cast %132 : vector<1x1x64xf32> to vector<1x64xf32>
    %134 = vector.broadcast %133 : vector<1x64xf32> to vector<16x64xf32>
    %135 = arith.addf %131, %134 : vector<16x64xf32>
    %cst_60 = arith.constant 0.000000e+00 : f32
    %136 = vector.broadcast %cst_60 : f32 to vector<16x64xf32>
    %137 = arith.maximumf %135, %136 : vector<16x64xf32>
    %c0_61 = arith.constant 0 : index
    %c0_62 = arith.constant 0 : index
    %c0_63 = arith.constant 0 : index
    %138 = vector.load %arg10[%c0_61, %c0_62, %c0_63] : memref<2x64x32xf32, #tpu.memory_space<vmem>>, vector<1x64x32xf32>
    %139 = vector.shape_cast %138 : vector<1x64x32xf32> to vector<64x32xf32>
    %cst_64 = arith.constant dense<0.000000e+00> : vector<16x32xf32>
    %140 = tpu.matmul %137, %139, %cst_64 {dimension_numbers = #tpu.dot_dimension_numbers<[1], [0], [0], [1], [0, 0, 1, 1], [], []>} : vector<16x64xf32>, vector<64x32xf32>, vector<16x32xf32> -> vector<16x32xf32>
    %c0_65 = arith.constant 0 : index
    %c0_66 = arith.constant 0 : index
    %c0_67 = arith.constant 0 : index
    %141 = vector.load %arg11[%c0_65, %c0_66, %c0_67] : memref<2x1x32xf32, #tpu.memory_space<vmem>>, vector<1x1x32xf32>
    %142 = vector.shape_cast %141 : vector<1x1x32xf32> to vector<1x32xf32>
    %143 = vector.broadcast %142 : vector<1x32xf32> to vector<16x32xf32>
    %144 = arith.addf %140, %143 : vector<16x32xf32>
    %145 = arith.addf %101, %144 : vector<16x32xf32>
    %c1_68 = arith.constant 1 : index
    %c0_69 = arith.constant 0 : index
    %c0_70 = arith.constant 0 : index
    %146 = vector.load %arg6[%c1_68, %c0_69, %c0_70] : memref<2x1x32xf32, #tpu.memory_space<vmem>>, vector<1x1x32xf32>
    %147 = vector.shape_cast %146 : vector<1x1x32xf32> to vector<1x32xf32>
    %c1_71 = arith.constant 1 : index
    %c0_72 = arith.constant 0 : index
    %c0_73 = arith.constant 0 : index
    %148 = vector.load %arg7[%c1_71, %c0_72, %c0_73] : memref<2x1x32xf32, #tpu.memory_space<vmem>>, vector<1x1x32xf32>
    %149 = vector.shape_cast %148 : vector<1x1x32xf32> to vector<1x32xf32>
    %cst_74 = arith.constant dense<0.000000e+00> : vector<16xf32>
    %150 = vector.multi_reduction <add>, %145, %cst_74 [1] : vector<16x32xf32> to vector<16xf32>
    %151 = vector.shape_cast %150 : vector<16xf32> to vector<16x1xf32>
    %cst_75 = arith.constant 3.200000e+01 : f32
    %152 = vector.broadcast %cst_75 : f32 to vector<16x1xf32>
    %153 = arith.divf %151, %152 : vector<16x1xf32>
    %154 = vector.broadcast %153 : vector<16x1xf32> to vector<16x32xf32>
    %155 = arith.subf %145, %154 : vector<16x32xf32>
    %156 = arith.mulf %155, %155 : vector<16x32xf32>
    %cst_76 = arith.constant dense<0.000000e+00> : vector<16xf32>
    %157 = vector.multi_reduction <add>, %156, %cst_76 [1] : vector<16x32xf32> to vector<16xf32>
    %158 = vector.shape_cast %157 : vector<16xf32> to vector<16x1xf32>
    %cst_77 = arith.constant 3.200000e+01 : f32
    %159 = vector.broadcast %cst_77 : f32 to vector<16x1xf32>
    %160 = arith.divf %158, %159 : vector<16x1xf32>
    %161 = math.sqrt %160 : vector<16x1xf32>
    %cst_78 = arith.constant 9.99999997E-7 : f32
    %162 = vector.broadcast %cst_78 : f32 to vector<16x1xf32>
    %163 = arith.addf %161, %162 : vector<16x1xf32>
    %164 = tpu.reciprocal %163 {approx = true} : vector<16x1xf32> -> vector<16x1xf32>
    %165 = vector.broadcast %153 : vector<16x1xf32> to vector<16x32xf32>
    %166 = arith.subf %145, %165 : vector<16x32xf32>
    %167 = vector.broadcast %147 : vector<1x32xf32> to vector<16x32xf32>
    %168 = arith.mulf %167, %166 : vector<16x32xf32>
    %169 = vector.broadcast %164 : vector<16x1xf32> to vector<16x32xf32>
    %170 = arith.mulf %168, %169 : vector<16x32xf32>
    %171 = vector.broadcast %149 : vector<1x32xf32> to vector<16x32xf32>
    %172 = arith.addf %170, %171 : vector<16x32xf32>
    %c1_79 = arith.constant 1 : index
    %c0_80 = arith.constant 0 : index
    %c0_81 = arith.constant 0 : index
    %173 = vector.load %arg2[%c1_79, %c0_80, %c0_81] : memref<2x32x96xf32, #tpu.memory_space<vmem>>, vector<1x32x96xf32>
    %174 = vector.shape_cast %173 : vector<1x32x96xf32> to vector<32x96xf32>
    %cst_82 = arith.constant dense<0.000000e+00> : vector<16x96xf32>
    %175 = tpu.matmul %172, %174, %cst_82 {dimension_numbers = #tpu.dot_dimension_numbers<[1], [0], [0], [1], [0, 0, 1, 1], [], []>} : vector<16x32xf32>, vector<32x96xf32>, vector<16x96xf32> -> vector<16x96xf32>
    %c1_83 = arith.constant 1 : index
    %c0_84 = arith.constant 0 : index
    %c0_85 = arith.constant 0 : index
    %176 = vector.load %arg3[%c1_83, %c0_84, %c0_85] : memref<2x1x96xf32, #tpu.memory_space<vmem>>, vector<1x1x96xf32>
    %177 = vector.shape_cast %176 : vector<1x1x96xf32> to vector<1x96xf32>
    %178 = vector.broadcast %177 : vector<1x96xf32> to vector<16x96xf32>
    %179 = arith.addf %175, %178 : vector<16x96xf32>
    %180 = vector.extract_strided_slice %179 {offsets = [0, 0], sizes = [16, 8], strides = [1, 1]} : vector<16x96xf32> to vector<16x8xf32>
    %181 = vector.shape_cast %180 : vector<16x8xf32> to vector<2x8x8xf32>
    %182 = vector.extract_strided_slice %179 {offsets = [0, 8], sizes = [16, 8], strides = [1, 1]} : vector<16x96xf32> to vector<16x8xf32>
    %183 = vector.shape_cast %182 : vector<16x8xf32> to vector<2x8x8xf32>
    %184 = vector.extract_strided_slice %179 {offsets = [0, 16], sizes = [16, 8], strides = [1, 1]} : vector<16x96xf32> to vector<16x8xf32>
    %185 = vector.shape_cast %184 : vector<16x8xf32> to vector<2x8x8xf32>
    %186 = vector.extract_strided_slice %179 {offsets = [0, 24], sizes = [16, 8], strides = [1, 1]} : vector<16x96xf32> to vector<16x8xf32>
    %187 = vector.shape_cast %186 : vector<16x8xf32> to vector<2x8x8xf32>
    %188 = tpu.concatenate %181, %183, %185, %187 in 0 : vector<2x8x8xf32>, vector<2x8x8xf32>, vector<2x8x8xf32>, vector<2x8x8xf32> -> vector<8x8x8xf32>
    %189 = vector.extract_strided_slice %179 {offsets = [0, 32], sizes = [16, 8], strides = [1, 1]} : vector<16x96xf32> to vector<16x8xf32>
    %190 = vector.shape_cast %189 : vector<16x8xf32> to vector<2x8x8xf32>
    %191 = vector.extract_strided_slice %179 {offsets = [0, 40], sizes = [16, 8], strides = [1, 1]} : vector<16x96xf32> to vector<16x8xf32>
    %192 = vector.shape_cast %191 : vector<16x8xf32> to vector<2x8x8xf32>
    %193 = vector.extract_strided_slice %179 {offsets = [0, 48], sizes = [16, 8], strides = [1, 1]} : vector<16x96xf32> to vector<16x8xf32>
    %194 = vector.shape_cast %193 : vector<16x8xf32> to vector<2x8x8xf32>
    %195 = vector.extract_strided_slice %179 {offsets = [0, 56], sizes = [16, 8], strides = [1, 1]} : vector<16x96xf32> to vector<16x8xf32>
    %196 = vector.shape_cast %195 : vector<16x8xf32> to vector<2x8x8xf32>
    %197 = tpu.concatenate %190, %192, %194, %196 in 0 : vector<2x8x8xf32>, vector<2x8x8xf32>, vector<2x8x8xf32>, vector<2x8x8xf32> -> vector<8x8x8xf32>
    %198 = vector.extract_strided_slice %179 {offsets = [0, 64], sizes = [16, 8], strides = [1, 1]} : vector<16x96xf32> to vector<16x8xf32>
    %199 = vector.shape_cast %198 : vector<16x8xf32> to vector<2x8x8xf32>
    %200 = vector.extract_strided_slice %179 {offsets = [0, 72], sizes = [16, 8], strides = [1, 1]} : vector<16x96xf32> to vector<16x8xf32>
    %201 = vector.shape_cast %200 : vector<16x8xf32> to vector<2x8x8xf32>
    %202 = vector.extract_strided_slice %179 {offsets = [0, 80], sizes = [16, 8], strides = [1, 1]} : vector<16x96xf32> to vector<16x8xf32>
    %203 = vector.shape_cast %202 : vector<16x8xf32> to vector<2x8x8xf32>
    %204 = vector.extract_strided_slice %179 {offsets = [0, 88], sizes = [16, 8], strides = [1, 1]} : vector<16x96xf32> to vector<16x8xf32>
    %205 = vector.shape_cast %204 : vector<16x8xf32> to vector<2x8x8xf32>
    %206 = tpu.concatenate %199, %201, %203, %205 in 0 : vector<2x8x8xf32>, vector<2x8x8xf32>, vector<2x8x8xf32>, vector<2x8x8xf32> -> vector<8x8x8xf32>
    "tpu.trace_start"() <{level = 10 : i32, message = "bqd,bkd->bqk"}> : () -> ()
    %cst_86 = arith.constant dense<0.000000e+00> : vector<8x8x8xf32>
    %207 = tpu.matmul %188, %197, %cst_86 {dimension_numbers = #tpu.dot_dimension_numbers<[2], [2], [1], [1], [0, 0, 0, 1, 1, 1], [0], [0]>} : vector<8x8x8xf32>, vector<8x8x8xf32>, vector<8x8x8xf32> -> vector<8x8x8xf32>
    "tpu.trace_stop"() : () -> ()
    %cst_87 = arith.constant dense<0xFF800000> : vector<8x8xf32>
    %208 = vector.multi_reduction <maximumf>, %207, %cst_87 [2] : vector<8x8x8xf32> to vector<8x8xf32>
    %209 = vector.shape_cast %208 : vector<8x8xf32> to vector<8x8x1xf32>
    %210 = vector.broadcast %209 : vector<8x8x1xf32> to vector<8x8x8xf32>
    %211 = arith.subf %207, %210 : vector<8x8x8xf32>
    %212 = math.exp %211 : vector<8x8x8xf32>
    %cst_88 = arith.constant dense<0.000000e+00> : vector<8x8xf32>
    %213 = vector.multi_reduction <add>, %212, %cst_88 [2] : vector<8x8x8xf32> to vector<8x8xf32>
    %214 = vector.shape_cast %213 : vector<8x8xf32> to vector<8x8x1xf32>
    %215 = tpu.reciprocal %214 {approx = true} : vector<8x8x1xf32> -> vector<8x8x1xf32>
    %216 = vector.broadcast %215 : vector<8x8x1xf32> to vector<8x8x8xf32>
    %217 = arith.mulf %212, %216 : vector<8x8x8xf32>
    "tpu.trace_start"() <{level = 10 : i32, message = "bqk,bkd->bqd"}> : () -> ()
    %cst_89 = arith.constant dense<0.000000e+00> : vector<8x8x8xf32>
    %218 = tpu.matmul %217, %206, %cst_89 {dimension_numbers = #tpu.dot_dimension_numbers<[2], [1], [1], [2], [0, 0, 0, 1, 1, 2], [0], [0]>} : vector<8x8x8xf32>, vector<8x8x8xf32>, vector<8x8x8xf32> -> vector<8x8x8xf32>
    "tpu.trace_stop"() : () -> ()
    %c1_90 = arith.constant 1 : index
    %c0_91 = arith.constant 0 : index
    %c0_92 = arith.constant 0 : index
    %219 = vector.load %arg5[%c1_90, %c0_91, %c0_92] : memref<2x1x32xf32, #tpu.memory_space<vmem>>, vector<1x1x32xf32>
    %220 = vector.shape_cast %219 : vector<1x1x32xf32> to vector<1x32xf32>
    %221 = vector.extract_strided_slice %218 {offsets = [0, 0, 0], sizes = [2, 8, 8], strides = [1, 1, 1]} : vector<8x8x8xf32> to vector<2x8x8xf32>
    %222 = vector.shape_cast %221 : vector<2x8x8xf32> to vector<16x8xf32>
    %c1_93 = arith.constant 1 : index
    %c0_94 = arith.constant 0 : index
    %c0_95 = arith.constant 0 : index
    %c0_96 = arith.constant 0 : index
    %223 = vector.load %arg4[%c1_93, %c0_94, %c0_95, %c0_96] : memref<2x4x8x32xf32, #tpu.memory_space<vmem>>, vector<1x1x8x32xf32>
    %224 = vector.shape_cast %223 : vector<1x1x8x32xf32> to vector<8x32xf32>
    %cst_97 = arith.constant dense<0.000000e+00> : vector<16x32xf32>
    %225 = tpu.matmul %222, %224, %cst_97 {dimension_numbers = #tpu.dot_dimension_numbers<[1], [0], [0], [1], [0, 0, 1, 1], [], []>} : vector<16x8xf32>, vector<8x32xf32>, vector<16x32xf32> -> vector<16x32xf32>
    %226 = vector.broadcast %220 : vector<1x32xf32> to vector<16x32xf32>
    %227 = arith.addf %226, %225 : vector<16x32xf32>
    %228 = vector.extract_strided_slice %218 {offsets = [2, 0, 0], sizes = [2, 8, 8], strides = [1, 1, 1]} : vector<8x8x8xf32> to vector<2x8x8xf32>
    %229 = vector.shape_cast %228 : vector<2x8x8xf32> to vector<16x8xf32>
    %c1_98 = arith.constant 1 : index
    %c1_99 = arith.constant 1 : index
    %c0_100 = arith.constant 0 : index
    %c0_101 = arith.constant 0 : index
    %230 = vector.load %arg4[%c1_98, %c1_99, %c0_100, %c0_101] : memref<2x4x8x32xf32, #tpu.memory_space<vmem>>, vector<1x1x8x32xf32>
    %231 = vector.shape_cast %230 : vector<1x1x8x32xf32> to vector<8x32xf32>
    %cst_102 = arith.constant dense<0.000000e+00> : vector<16x32xf32>
    %232 = tpu.matmul %229, %231, %cst_102 {dimension_numbers = #tpu.dot_dimension_numbers<[1], [0], [0], [1], [0, 0, 1, 1], [], []>} : vector<16x8xf32>, vector<8x32xf32>, vector<16x32xf32> -> vector<16x32xf32>
    %233 = arith.addf %227, %232 : vector<16x32xf32>
    %234 = vector.extract_strided_slice %218 {offsets = [4, 0, 0], sizes = [2, 8, 8], strides = [1, 1, 1]} : vector<8x8x8xf32> to vector<2x8x8xf32>
    %235 = vector.shape_cast %234 : vector<2x8x8xf32> to vector<16x8xf32>
    %c1_103 = arith.constant 1 : index
    %c2_104 = arith.constant 2 : index
    %c0_105 = arith.constant 0 : index
    %c0_106 = arith.constant 0 : index
    %236 = vector.load %arg4[%c1_103, %c2_104, %c0_105, %c0_106] : memref<2x4x8x32xf32, #tpu.memory_space<vmem>>, vector<1x1x8x32xf32>
    %237 = vector.shape_cast %236 : vector<1x1x8x32xf32> to vector<8x32xf32>
    %cst_107 = arith.constant dense<0.000000e+00> : vector<16x32xf32>
    %238 = tpu.matmul %235, %237, %cst_107 {dimension_numbers = #tpu.dot_dimension_numbers<[1], [0], [0], [1], [0, 0, 1, 1], [], []>} : vector<16x8xf32>, vector<8x32xf32>, vector<16x32xf32> -> vector<16x32xf32>
    %239 = arith.addf %233, %238 : vector<16x32xf32>
    %240 = vector.extract_strided_slice %218 {offsets = [6, 0, 0], sizes = [2, 8, 8], strides = [1, 1, 1]} : vector<8x8x8xf32> to vector<2x8x8xf32>
    %241 = vector.shape_cast %240 : vector<2x8x8xf32> to vector<16x8xf32>
    %c1_108 = arith.constant 1 : index
    %c3_109 = arith.constant 3 : index
    %c0_110 = arith.constant 0 : index
    %c0_111 = arith.constant 0 : index
    %242 = vector.load %arg4[%c1_108, %c3_109, %c0_110, %c0_111] : memref<2x4x8x32xf32, #tpu.memory_space<vmem>>, vector<1x1x8x32xf32>
    %243 = vector.shape_cast %242 : vector<1x1x8x32xf32> to vector<8x32xf32>
    %cst_112 = arith.constant dense<0.000000e+00> : vector<16x32xf32>
    %244 = tpu.matmul %241, %243, %cst_112 {dimension_numbers = #tpu.dot_dimension_numbers<[1], [0], [0], [1], [0, 0, 1, 1], [], []>} : vector<16x8xf32>, vector<8x32xf32>, vector<16x32xf32> -> vector<16x32xf32>
    %245 = arith.addf %239, %244 : vector<16x32xf32>
    %246 = arith.addf %145, %245 : vector<16x32xf32>
    %c1_113 = arith.constant 1 : index
    %c0_114 = arith.constant 0 : index
    %c0_115 = arith.constant 0 : index
    %247 = vector.load %arg12[%c1_113, %c0_114, %c0_115] : memref<2x1x32xf32, #tpu.memory_space<vmem>>, vector<1x1x32xf32>
    %248 = vector.shape_cast %247 : vector<1x1x32xf32> to vector<1x32xf32>
    %c1_116 = arith.constant 1 : index
    %c0_117 = arith.constant 0 : index
    %c0_118 = arith.constant 0 : index
    %249 = vector.load %arg13[%c1_116, %c0_117, %c0_118] : memref<2x1x32xf32, #tpu.memory_space<vmem>>, vector<1x1x32xf32>
    %250 = vector.shape_cast %249 : vector<1x1x32xf32> to vector<1x32xf32>
    %cst_119 = arith.constant dense<0.000000e+00> : vector<16xf32>
    %251 = vector.multi_reduction <add>, %246, %cst_119 [1] : vector<16x32xf32> to vector<16xf32>
    %252 = vector.shape_cast %251 : vector<16xf32> to vector<16x1xf32>
    %cst_120 = arith.constant 3.200000e+01 : f32
    %253 = vector.broadcast %cst_120 : f32 to vector<16x1xf32>
    %254 = arith.divf %252, %253 : vector<16x1xf32>
    %255 = vector.broadcast %254 : vector<16x1xf32> to vector<16x32xf32>
    %256 = arith.subf %246, %255 : vector<16x32xf32>
    %257 = arith.mulf %256, %256 : vector<16x32xf32>
    %cst_121 = arith.constant dense<0.000000e+00> : vector<16xf32>
    %258 = vector.multi_reduction <add>, %257, %cst_121 [1] : vector<16x32xf32> to vector<16xf32>
    %259 = vector.shape_cast %258 : vector<16xf32> to vector<16x1xf32>
    %cst_122 = arith.constant 3.200000e+01 : f32
    %260 = vector.broadcast %cst_122 : f32 to vector<16x1xf32>
    %261 = arith.divf %259, %260 : vector<16x1xf32>
    %262 = math.sqrt %261 : vector<16x1xf32>
    %cst_123 = arith.constant 9.99999997E-7 : f32
    %263 = vector.broadcast %cst_123 : f32 to vector<16x1xf32>
    %264 = arith.addf %262, %263 : vector<16x1xf32>
    %265 = tpu.reciprocal %264 {approx = true} : vector<16x1xf32> -> vector<16x1xf32>
    %266 = vector.broadcast %254 : vector<16x1xf32> to vector<16x32xf32>
    %267 = arith.subf %246, %266 : vector<16x32xf32>
    %268 = vector.broadcast %248 : vector<1x32xf32> to vector<16x32xf32>
    %269 = arith.mulf %268, %267 : vector<16x32xf32>
    %270 = vector.broadcast %265 : vector<16x1xf32> to vector<16x32xf32>
    %271 = arith.mulf %269, %270 : vector<16x32xf32>
    %272 = vector.broadcast %250 : vector<1x32xf32> to vector<16x32xf32>
    %273 = arith.addf %271, %272 : vector<16x32xf32>
    %c1_124 = arith.constant 1 : index
    %c0_125 = arith.constant 0 : index
    %c0_126 = arith.constant 0 : index
    %274 = vector.load %arg8[%c1_124, %c0_125, %c0_126] : memref<2x32x64xf32, #tpu.memory_space<vmem>>, vector<1x32x64xf32>
    %275 = vector.shape_cast %274 : vector<1x32x64xf32> to vector<32x64xf32>
    %cst_127 = arith.constant dense<0.000000e+00> : vector<16x64xf32>
    %276 = tpu.matmul %273, %275, %cst_127 {dimension_numbers = #tpu.dot_dimension_numbers<[1], [0], [0], [1], [0, 0, 1, 1], [], []>} : vector<16x32xf32>, vector<32x64xf32>, vector<16x64xf32> -> vector<16x64xf32>
    %c1_128 = arith.constant 1 : index
    %c0_129 = arith.constant 0 : index
    %c0_130 = arith.constant 0 : index
    %277 = vector.load %arg9[%c1_128, %c0_129, %c0_130] : memref<2x1x64xf32, #tpu.memory_space<vmem>>, vector<1x1x64xf32>
    %278 = vector.shape_cast %277 : vector<1x1x64xf32> to vector<1x64xf32>
    %279 = vector.broadcast %278 : vector<1x64xf32> to vector<16x64xf32>
    %280 = arith.addf %276, %279 : vector<16x64xf32>
    %cst_131 = arith.constant 0.000000e+00 : f32
    %281 = vector.broadcast %cst_131 : f32 to vector<16x64xf32>
    %282 = arith.maximumf %280, %281 : vector<16x64xf32>
    %c1_132 = arith.constant 1 : index
    %c0_133 = arith.constant 0 : index
    %c0_134 = arith.constant 0 : index
    %283 = vector.load %arg10[%c1_132, %c0_133, %c0_134] : memref<2x64x32xf32, #tpu.memory_space<vmem>>, vector<1x64x32xf32>
    %284 = vector.shape_cast %283 : vector<1x64x32xf32> to vector<64x32xf32>
    %cst_135 = arith.constant dense<0.000000e+00> : vector<16x32xf32>
    %285 = tpu.matmul %282, %284, %cst_135 {dimension_numbers = #tpu.dot_dimension_numbers<[1], [0], [0], [1], [0, 0, 1, 1], [], []>} : vector<16x64xf32>, vector<64x32xf32>, vector<16x32xf32> -> vector<16x32xf32>
    %c1_136 = arith.constant 1 : index
    %c0_137 = arith.constant 0 : index
    %c0_138 = arith.constant 0 : index
    %286 = vector.load %arg11[%c1_136, %c0_137, %c0_138] : memref<2x1x32xf32, #tpu.memory_space<vmem>>, vector<1x1x32xf32>
    %287 = vector.shape_cast %286 : vector<1x1x32xf32> to vector<1x32xf32>
    %288 = vector.broadcast %287 : vector<1x32xf32> to vector<16x32xf32>
    %289 = arith.addf %285, %288 : vector<16x32xf32>
    %290 = arith.addf %246, %289 : vector<16x32xf32>
    %c0_139 = arith.constant 0 : index
    %c0_140 = arith.constant 0 : index
    %291 = vector.load %arg14[%c0_139, %c0_140] : memref<16x32xf32, #tpu.memory_space<vmem>>, vector<16x32xf32>
    tpu.vector_store %arg14[%c0_139, %c0_140], %290 {strides = array<i32>} : memref<16x32xf32, #tpu.memory_space<vmem>>, vector<16x32xf32>,
    return
  }
  func.func @transform_0(%arg0: i32) -> (i32, i32) {
    %c0_i32 = arith.constant 0 : i32
    %c0_i32_0 = arith.constant 0 : i32
    return %arg0, %c0_i32 : i32, i32
  }
  func.func @transform_1(%arg0: i32) -> (i32, i32, i32) {
    %c0_i32 = arith.constant 0 : i32
    %c0_i32_0 = arith.constant 0 : i32
    %c0_i32_1 = arith.constant 0 : i32
    %c0_i32_2 = arith.constant 0 : i32
    return %c0_i32, %c0_i32_0, %c0_i32_1 : i32, i32, i32
  }
  func.func @transform_2(%arg0: i32) -> (i32, i32, i32) {
    %c0_i32 = arith.constant 0 : i32
    %c0_i32_0 = arith.constant 0 : i32
    %c0_i32_1 = arith.constant 0 : i32
    %c0_i32_2 = arith.constant 0 : i32
    return %c0_i32, %c0_i32_0, %c0_i32_1 : i32, i32, i32
  }
  func.func @transform_3(%arg0: i32) -> (i32, i32, i32, i32) {
    %c0_i32 = arith.constant 0 : i32
    %c0_i32_0 = arith.constant 0 : i32
    %c0_i32_1 = arith.constant 0 : i32
    %c0_i32_2 = arith.constant 0 : i32
    %c0_i32_3 = arith.constant 0 : i32
    return %c0_i32, %c0_i32_0, %c0_i32_1, %c0_i32_2 : i32, i32, i32, i32
  }
  func.func @transform_4(%arg0: i32) -> (i32, i32, i32) {
    %c0_i32 = arith.constant 0 : i32
    %c0_i32_0 = arith.constant 0 : i32
    %c0_i32_1 = arith.constant 0 : i32
    %c0_i32_2 = arith.constant 0 : i32
    return %c0_i32, %c0_i32_0, %c0_i32_1 : i32, i32, i32
  }
  func.func @transform_5(%arg0: i32) -> (i32, i32, i32) {
    %c0_i32 = arith.constant 0 : i32
    %c0_i32_0 = arith.constant 0 : i32
    %c0_i32_1 = arith.constant 0 : i32
    %c0_i32_2 = arith.constant 0 : i32
    return %c0_i32, %c0_i32_0, %c0_i32_1 : i32, i32, i32
  }
  func.func @transform_6(%arg0: i32) -> (i32, i32, i32) {
    %c0_i32 = arith.constant 0 : i32
    %c0_i32_0 = arith.constant 0 : i32
    %c0_i32_1 = arith.constant 0 : i32
    %c0_i32_2 = arith.constant 0 : i32
    return %c0_i32, %c0_i32_0, %c0_i32_1 : i32, i32, i32
  }
  func.func @transform_7(%arg0: i32) -> (i32, i32, i32) {
    %c0_i32 = arith.constant 0 : i32
    %c0_i32_0 = arith.constant 0 : i32
    %c0_i32_1 = arith.constant 0 : i32
    %c0_i32_2 = arith.constant 0 : i32
    return %c0_i32, %c0_i32_0, %c0_i32_1 : i32, i32, i32
  }
  func.func @transform_8(%arg0: i32) -> (i32, i32, i32) {
    %c0_i32 = arith.constant 0 : i32
    %c0_i32_0 = arith.constant 0 : i32
    %c0_i32_1 = arith.constant 0 : i32
    %c0_i32_2 = arith.constant 0 : i32
    return %c0_i32, %c0_i32_0, %c0_i32_1 : i32, i32, i32
  }
  func.func @transform_9(%arg0: i32) -> (i32, i32, i32) {
    %c0_i32 = arith.constant 0 : i32
    %c0_i32_0 = arith.constant 0 : i32
    %c0_i32_1 = arith.constant 0 : i32
    %c0_i32_2 = arith.constant 0 : i32
    return %c0_i32, %c0_i32_0, %c0_i32_1 : i32, i32, i32
  }
  func.func @transform_10(%arg0: i32) -> (i32, i32, i32) {
    %c0_i32 = arith.constant 0 : i32
    %c0_i32_0 = arith.constant 0 : i32
    %c0_i32_1 = arith.constant 0 : i32
    %c0_i32_2 = arith.constant 0 : i32
    return %c0_i32, %c0_i32_0, %c0_i32_1 : i32, i32, i32
  }
  func.func @transform_11(%arg0: i32) -> (i32, i32, i32) {
    %c0_i32 = arith.constant 0 : i32
    %c0_i32_0 = arith.constant 0 : i32
    %c0_i32_1 = arith.constant 0 : i32
    %c0_i32_2 = arith.constant 0 : i32
    return %c0_i32, %c0_i32_0, %c0_i32_1 : i32, i32, i32
  }
  func.func @transform_12(%arg0: i32) -> (i32, i32, i32) {
    %c0_i32 = arith.constant 0 : i32
    %c0_i32_0 = arith.constant 0 : i32
    %c0_i32_1 = arith.constant 0 : i32
    %c0_i32_2 = arith.constant 0 : i32
    return %c0_i32, %c0_i32_0, %c0_i32_1 : i32, i32, i32
  }
  func.func @transform_13(%arg0: i32) -> (i32, i32) {
    %c0_i32 = arith.constant 0 : i32
    %c0_i32_0 = arith.constant 0 : i32
    return %arg0, %c0_i32 : i32, i32
  }
}

</mosaic_0001>

<bundles_post_ra>
// kernel: tpu_custom_call.1
= control target key start
LH: loop header
LB: loop body
LE: loop exit
PB: predicated region body
PF: predicated region fallthrough
CT: control target
= control target key end

     0   :  { %18 = vsyncpa [#allocation3], 0  ;;  %s5909_s0 = inlined_call_operand.hbm [shape: f32[16,32], index: 0, kind: input, shape index: {}, may-alias: {0,13}]   ;;  %s5910_s1 = inlined_call_operand.vmem [shape: f32[2,32,96], index: 1, kind: input, shape index: {}]   ;;  %s5911_s2 = inlined_call_operand.vmem [shape: f32[2,1,96], index: 2, kind: input, shape index: {}]   ;;  %s5912_s3 = inlined_call_operand.vmem [shape: f32[2,4,8,32], index: 3, kind: input, shape index: {}]   ;;  %s5913_s4 = inlined_call_operand.hbm [shape: f32[2,1,32], index: 4, kind: input, shape index: {}]   ;;  %s5914_s5 = inlined_call_operand.hbm [shape: f32[2,1,32], index: 5, kind: input, shape index: {}]   ;;  %s5915_s6 = inlined_call_operand.hbm [shape: f32[2,1,32], index: 6, kind: input, shape index: {}]   ;;  %s5916_s7 = inlined_call_operand.vmem [shape: f32[2,32,64], index: 7, kind: input, shape index: {}]   ;;  %s5917_s8 = inlined_call_operand.hbm [shape: f32[2,1,64], index: 8, kind: input, shape index: {}]   ;;  %s5918_s9 = inlined_call_operand.vmem [shape: f32[2,64,32], index: 9, kind: input, shape index: {}]   ;;  %s5919_s10 = inlined_call_operand.vmem [shape: f32[2,1,32], index: 10, kind: input, shape index: {}]   ;;  %s5920_s11 = inlined_call_operand.vmem [shape: f32[2,1,32], index: 11, kind: input, shape index: {}]   ;;  %s5921_s12 = inlined_call_operand.vmem [shape: f32[2,1,32], index: 12, kind: input, shape index: {}]   ;;  %s5922_s13 = inlined_call_operand.hbm [shape: f32[16,32], index: 13, kind: output, shape index: {}, may-alias: {0,13}]  }
   0x1   :  { %19 = vsyncpa [#allocation6], 0 }
   0x2   :  { %20 = vsyncpa [#allocation9], 0 }
   0x3   :  { %21 = vsyncpa [#allocation4], 0  ;;  %s5150_s25 = smov [#allocation5]   ;;  %s5010_s29 = scalar_lea.hbm %s5913_s4, 32 }
   0x4   :  { %s45_s26 = sshll.u32 %s5150_s25, 4  ;;  %p5011_p0 = scmp.ne.s32.totalorder %s5913_s4, %s5010_s29  ;;  %s46_s26 = int_to_ptr.vmem [resolvable:$true] %s45_s26 }
   0x5   :  { %p5014_p1 = scmp.lt.u32.totalorder %s5010_s29, %s5913_s4 }
   0x7   :  { %p5016_p2 = pnand %p5014_p1, %p5011_p0 }
   0x9   :  { %5019 = shalt.err (!%p5016_p2)
}
   0xa   :  { %s5020_s17 = scalar_lea.vmem %s46_s26, 32  ;;  %p5025_p4 = scmp.lt.s32.totalorder %s46_s26, %s46_s26 }
   0xb   :  { %p5021_p3 = scmp.ne.s32.totalorder %s46_s26, %s5020_s17  ;;  %p5026_p5 = scmp.lt.s32.totalorder %s5020_s17, %s5020_s17 }
   0xd   :  { %p5027_p6 = por %p5026_p5, %p5025_p4 }
   0xf   :  { %p5028_p7 = pnand %p5027_p6, %p5021_p3 }
  0x11   :  { %5031 = shalt.err (!%p5028_p7)
}
  0x12   :  { %s5151_s18 = smov 16   ;;  %s5152_s19 = smov 1  }
  0x13   :  { %51 = dma.hbm_to_vmem [thread:$0]  %s5913_s4, 32, %s46_s26, [#allocation6], %s5151_s18, %s5151_s18, %s5152_s19  }
  0x14   :  { %s5153_s22 = smov [#allocation8]   ;;  %s5154_s24 = smov [#allocation2]  }
  0x15   :  { %s69_s23 = sshll.u32 %s5153_s22, 4  ;;  %s27_s25 = sshll.u32 %s5154_s24, 4  ;;  %s70_s23 = int_to_ptr.vmem [resolvable:$true] %s69_s23  ;;  %s28_s25 = int_to_ptr.vmem [resolvable:$true] %s27_s25 }
  0x16   :  { %s5032_s29 = scalar_lea.hbm %s5915_s6, 32 }
  0x17   :  { %p5033_p8 = scmp.ne.s32.totalorder %s5915_s6, %s5032_s29  ;;  %p5036_p9 = scmp.lt.u32.totalorder %s5032_s29, %s5915_s6 }
  0x19   :  { %p5038_p10 = pnand %p5036_p9, %p5033_p8 }
  0x1b   :  { %5041 = shalt.err (!%p5038_p10)
}
  0x1c   :  { %s5042_s4 = scalar_lea.vmem %s70_s23, 32  ;;  %p5047_p12 = scmp.lt.s32.totalorder %s70_s23, %s70_s23 }
  0x1d   :  { %p5043_p11 = scmp.ne.s32.totalorder %s70_s23, %s5042_s4  ;;  %p5048_p13 = scmp.lt.s32.totalorder %s5042_s4, %s5042_s4 }
  0x1f   :  { %p5049_p0 = por %p5048_p13, %p5047_p12 }
  0x21   :  { %p5050_p1 = pnand %p5049_p0, %p5043_p11 }
  0x23   :  { %5053 = shalt.err (!%p5050_p1)
}
  0x24   :  { %75 = dma.hbm_to_vmem [thread:$0]  %s5915_s6, 32, %s70_s23, [#allocation9], %s5151_s18, %s5151_s18, %s5152_s19  }
  0x25   :  { %s5054_s22 = scalar_lea.hbm %s5909_s0, 256 }
  0x26   :  { %p5055_p2 = scmp.ne.s32.totalorder %s5909_s0, %s5054_s22  ;;  %p5058_p3 = scmp.lt.u32.totalorder %s5054_s22, %s5909_s0 }
  0x28   :  { %p5060_p4 = pnand %p5058_p3, %p5055_p2 }
  0x2a   :  { %5063 = shalt.err (!%p5060_p4)
}
  0x2b   :  { %s5064_s30 = scalar_lea.vmem %s28_s25, 256  ;;  %p5069_p6 = scmp.lt.s32.totalorder %s28_s25, %s28_s25 }
  0x2c   :  { %p5065_p5 = scmp.ne.s32.totalorder %s28_s25, %s5064_s30  ;;  %p5070_p7 = scmp.lt.s32.totalorder %s5064_s30, %s5064_s30 }
  0x2e   :  { %p5071_p8 = por %p5070_p7, %p5069_p6 }
  0x30   :  { %p5072_p9 = pnand %p5071_p8, %p5065_p5 }
  0x32   :  { %5075 = shalt.err (!%p5072_p9)
}
  0x33   :  { %s5155_s6 = smov 128   ;;  %s5156_s23 = smov 8  }
  0x34   :  { %33 = dma.hbm_to_vmem [thread:$0]  %s5909_s0, 256, %s28_s25, [#allocation3], %s5155_s6, %s5155_s6, %s5156_s23  }
  0x35   :  { %s5157_s16 = smov [#allocation7]   ;;  %s5158_s26 = smov [#allocation10]  }
  0x36   :  { %s57_s4 = sshll.u32 %s5157_s16, 4  ;;  %s83_s17 = sshll.u32 %s5158_s26, 4  ;;  %s58_s4 = int_to_ptr.vmem [resolvable:$true] %s57_s4  ;;  %s84_s17 = int_to_ptr.vmem [resolvable:$true] %s83_s17 }
  0x37   :  { %s5076_s22 = scalar_lea.hbm %s5914_s5, 32 }
  0x38   :  { %p5077_p10 = scmp.ne.s32.totalorder %s5914_s5, %s5076_s22  ;;  %p5080_p11 = scmp.lt.u32.totalorder %s5076_s22, %s5914_s5 }
  0x3a   :  { %p5082_p12 = pnand %p5080_p11, %p5077_p10 }
  0x3c   :  { %5085 = shalt.err (!%p5082_p12)
}
  0x3d   :  { %s5086_s0 = scalar_lea.vmem %s58_s4, 32  ;;  %p5091_p0 = scmp.lt.s32.totalorder %s58_s4, %s58_s4 }
  0x3e   :  { %p5087_p13 = scmp.ne.s32.totalorder %s58_s4, %s5086_s0  ;;  %p5092_p1 = scmp.lt.s32.totalorder %s5086_s0, %s5086_s0 }
  0x40   :  { %p5093_p2 = por %p5092_p1, %p5091_p0 }
  0x42   :  { %p5094_p3 = pnand %p5093_p2, %p5087_p13 }
  0x44   :  { %5097 = shalt.err (!%p5094_p3)
}
  0x45   :  { %63 = dma.hbm_to_vmem [thread:$0]  %s5914_s5, 32, %s58_s4, [#allocation6], %s5151_s18, %s5151_s18, %s5152_s19  }
  0x46   :  { %s5098_s16 = scalar_lea.hbm %s5917_s8, 32 }
  0x47   :  { %p5099_p4 = scmp.ne.s32.totalorder %s5917_s8, %s5098_s16  ;;  %p5102_p5 = scmp.lt.u32.totalorder %s5098_s16, %s5917_s8 }
  0x49   :  { %p5104_p6 = pnand %p5102_p5, %p5099_p4 }
  0x4b   :  { %5107 = shalt.err (!%p5104_p6)
}
  0x4c   :  { %s5108_s24 = scalar_lea.vmem %s84_s17, 32  ;;  %p5113_p8 = scmp.lt.s32.totalorder %s84_s17, %s84_s17 }
  0x4d   :  { %p5109_p7 = scmp.ne.s32.totalorder %s84_s17, %s5108_s24  ;;  %p5114_p9 = scmp.lt.s32.totalorder %s5108_s24, %s5108_s24 }
  0x4f   :  { %p5115_p10 = por %p5114_p9, %p5113_p8 }
  0x51   :  { %p5116_p11 = pnand %p5115_p10, %p5109_p7 }
  0x53   :  { %5119 = shalt.err (!%p5116_p11)
}
  0x54   :  { %89 = dma.hbm_to_vmem [thread:$0]  %s5917_s8, 32, %s84_s17, [#allocation9], %s5151_s18, %s5151_s18, %s5152_s19  }
  0x55   :  { %5142 = dma.done.wait [#allocation3], 256  }
  0x56   :  { %5143 = vsyncadd [#allocation3], 4294967040 }
  0x57   :  { %5144 = dma.done.wait [#allocation6], 64  }
  0x58   :  { %5145 = vsyncadd [#allocation6], 4294967232 }
  0x59   :  { %5146 = dma.done.wait [#allocation9], 64  }
  0x5a   :  { %5147 = vsyncadd [#allocation9], 4294967232  ;;  %vm117_vm0 = vcmask 261120   ;;  %v5312_v0 = vld [vmem:[#allocation2] sm:$0xff]  ;;  %v5314_v1 = vld [vmem:[#allocation2 + $0x8] sm:$0xff]  ;;  %v5159_v47 = vmov 0.0  }
  0x5b   :  { %v118_v2 = vsel %vm117_vm0, %v5312_v0, 0.0  ;;  %v121_v3 = vsel %vm117_vm0, %v5314_v1, 0.0  ;;  %v175_v14 = vld [vmem:[%s5910_s1] sm:$0xff]  ;;  %v176_v15 = vld [vmem:[%s5910_s1 + $0x8] sm:$0xff]  ;;  %v177_v16 = vld [vmem:[%s5910_s1 + $0x10] sm:$0xff]  ;;  %4551 = vmatprep.subr.mxu1 %v5159_v47  ;;  %vm5160_vm5 = vmmov 0  }
  0x5c   :  { %119 = vadd.xlane.f32.xlu0 %v118_v2  ;;  %v4817_v17 = vpack.c.bf16 %v176_v15, %v175_v14  ;;  %v178_v18 = vld [vmem:[%s5910_s1 + $0x18] sm:$0xff]  ;;  %v4284_v36 = vld [vmem:[#allocation7] ss:$0 sm:$0xff]  ;;  %v4285_v39 = vld [vmem:[#allocation8] ss:$0 sm:$0xff]  ;;  %4553 = vmatprep.mubr.msk.f32.mxu1 %vm5160_vm5, %v5159_v47  ;;  %s5161_s14 = smov 120  }
  0x5d   :  { %v4821_v19 = vpack.c.bf16 %v178_v18, %v177_v16  ;;  %v4286_v46 = vld [vmem:[%s5911_s2] ss:$0 sm:$0xff]  ;;  %s5162_s15 = smov 112   ;;  %s5163_s16 = smov 104   ;;  %vm283_vm6 = vcmask 64512   ;;  %vm2101_vm11 = vcmask 523264  }
  0x5e   :  { %4818 = vmatprep.subr.bf16.mxu0 %v4817_v17  ;;  %s5164_s26 = smov 96   ;;  %s5165_s20 = smov 64  }
  0x5f   :  { %4820 = vmatpush3.bf16.msra.mxu0 %v4817_v17 }
  0x60   :  { %122 = vadd.xlane.f32.xlu0 %v121_v3  ;;  %4822 = vmatprep.subr.bf16.mxu0 %v4821_v19 }
  0x63   :  { %4824 = vmatpush3.bf16.msra.mxu0 %v4821_v19 }
  0x64   :  { %4546 = vmatprep.subr.mxu0 %v5159_v47 }
  0xe9   :  { %v120_v4 = vpop.xlane.xlu0 %119 }
  0xea   :  { %v125_v5 = vmul.f32 0.03125, %v120_v4 }
  0xec   :  { %v127_v6 = vsub.f32 %v5312_v0, %v125_v5 }
  0xed   :  { %v123_v7 = vpop.xlane.xlu0 %122 }
  0xee   :  { %v126_v8 = vmul.f32 0.03125, %v123_v7  ;;  %v129_v9 = vmul.f32 %v127_v6, %v127_v6  ;;  %v163_v37 = vmul.f32 %v4284_v36, %v127_v6 }
  0xf0   :  { %v128_v10 = vsub.f32 %v5314_v1, %v126_v8  ;;  %v131_v11 = vsel %vm117_vm0, %v129_v9, 0.0 }
  0xf1   :  { %132 = vadd.xlane.f32.xlu1 %v131_v11 }
  0xf2   :  { %v130_v12 = vmul.f32 %v128_v10, %v128_v10  ;;  %v164_v41 = vmul.f32 %v4284_v36, %v128_v10 }
  0xf4   :  { %v134_v13 = vsel %vm117_vm0, %v130_v12, 0.0 }
  0xf5   :  { %135 = vadd.xlane.f32.xlu1 %v134_v13 }
 0x17e   :  { %v133_v20 = vpop.xlane.xlu1 %132 }
 0x17f   :  { %v137_v21 = vmul.f32 0.03125, %v133_v20 }
 0x181   :  { %4914 = vrsqrt.f32 %v137_v21  ;;  %vm141_vm1 = vcmp.eq.f32.partialorder %v137_v21, inf  ;;  %v144_v26 = vand.u32 2147483648, %v137_v21  ;;  %vm143_vm2 = vcmp.eq.f32.partialorder %v137_v21, 0.0 }
 0x182   :  { %v136_v22 = vpop.xlane.xlu1 %135 }
 0x183   :  { %v138_v23 = vmul.f32 0.03125, %v136_v22 }
 0x185   :  { %4916 = vrsqrt.f32 %v138_v23  ;;  %vm148_vm3 = vcmp.eq.f32.partialorder %v138_v23, inf  ;;  %v151_v32 = vand.u32 2147483648, %v138_v23  ;;  %vm150_vm4 = vcmp.eq.f32.partialorder %v138_v23, 0.0 }
 0x18b   :  { %v4915_v24 = vpop.eup %4914 }
 0x18c   :  { %v140_v25 = vmul.f32 %v4915_v24, %v137_v21 }
 0x18e   :  { %v142_v27 = vsel %vm141_vm1, %v137_v21, %v140_v25 }
 0x18f   :  { %v4917_v28 = vpop.eup %4916  ;;  %v145_v29 = vsel %vm143_vm2, %v144_v26, %v142_v27 }
 0x190   :  { %v147_v30 = vmul.f32 %v4917_v28, %v138_v23  ;;  %v153_v31 = vadd.f32 1e-06, %v145_v29 }
 0x192   :  { %v149_v33 = vsel %vm148_vm3, %v138_v23, %v147_v30  ;;  %4918 = vrcp.f32 %v153_v31 }
 0x193   :  { %v152_v34 = vsel %vm150_vm4, %v151_v32, %v149_v33 }
 0x194   :  { %v154_v35 = vadd.f32 1e-06, %v152_v34 }
 0x196   :  { %4920 = vrcp.f32 %v154_v35 }
 0x19c   :  { %v4919_v38 = vpop.eup %4918 }
 0x19d   :  { %v165_v40 = vmul.f32 %v4919_v38, %v163_v37 }
 0x19f   :  { %v173_v42 = vadd.f32 %v4285_v39, %v165_v40 }
 0x1a0   :  { %v4921_v43 = vpop.eup %4920 }
 0x1a1   :  { %v166_v44 = vmul.f32 %v4921_v43, %v164_v41  ;;  %4543 = vmatprep.mubr.msk.f32.mxu0 %vm117_vm0, %v173_v42 }
 0x1a3   :  { %v174_v45 = vadd.f32 %v4285_v39, %v166_v44 }
 0x1a5   :  { %4544 = vmatmul.mubr.msk.f32.vlgmr.msra.gmra.mrb[0].mxu0 %vm117_vm0, %v174_v45 }
 0x1a6   :  { %4548 = vmatprep.mubr.msk.f32.mxu0 %vm5160_vm5, %v5159_v47 }
 0x278   :  { %v4545_v48 = vpop.f32.mrb[0].mxu0 }
 0x279   :  { %v5347_v49 = vadd.f32 %v4545_v48, %v4286_v46  ;;  %v258_v50 = vpop.f32.mrb[1].mxu0 }
 0x27a   :  { %v5349_v51 = vadd.f32 %v4286_v46, %v258_v50 }
 0x27b   :  { %271 = vrot.lane.b32.xlu1 %v5347_v49, %s5161_s14 }
 0x27c   :  { %269 = vrot.lane.b32.xlu0 %v5349_v51, %s5161_s14 }
 0x27f   :  { %273 = vrot.lane.b32.xlu1 %v5349_v51, %s5162_s15 }
 0x280   :  { %277 = vrot.lane.b32.xlu0 %v5349_v51, %s5163_s16 }
 0x283   :  { %275 = vrot.lane.b32.xlu1 %v5347_v49, %s5162_s15 }
 0x284   :  { %281 = vrot.lane.b32.xlu0 %v5349_v51, %s5164_s26 }
 0x287   :  { %279 = vrot.lane.b32.xlu1 %v5347_v49, %s5163_s16 }
 0x28b   :  { %358 = vrot.lane.b32.xlu1 %v5347_v49, %s5164_s26 }
 0x2ed   :  { %v5367_v52 = vpop.permute.xlu1 %271 }
 0x2ee   :  { %510 = vrot.lane.b32.xlu1 %v5367_v52, %s5164_s26  ;;  %v5371_v53 = vpop.permute.xlu0 %269 }
 0x2ef   :  { %434 = vrot.lane.b32.xlu0 %v5371_v53, %s5164_s26 }
 0x2f1   :  { %v5375_v54 = vpop.permute.xlu1 %273 }
 0x2f2   :  { %v5377_v55 = vpop.permute.xlu0 %277 }
 0x2f3   :  { %586 = vrot.lane.b32.xlu0 %v5375_v54, %s5164_s26 }
 0x2f5   :  { %v5381_v56 = vpop.permute.xlu1 %275 }
 0x2f6   :  { %662 = vrot.lane.b32.xlu1 %v5381_v56, %s5164_s26  ;;  %v282_v57 = vpop.permute.xlu0 %281 }
 0x2f7   :  { %738 = vrot.lane.b32.xlu0 %v5377_v55, %s5164_s26  ;;  %4547 = vmatpush3.xpose.msk.msra.mxu0 %vm283_vm6, %v282_v57 }
 0x2f8   :  { %4556 = vmatprep.subr.mxu0 %v5159_v47 }
 0x2f9   :  { %v5389_v58 = vpop.permute.xlu1 %279 }
 0x2fa   :  { %814 = vrot.lane.b32.xlu1 %v5389_v58, %s5164_s26  ;;  %4549 = vmatmul.mubr.msk.f32.vlgmr.msra.gmra.mrb[2].mxu0 %vm283_vm6, %v5349_v51 }
 0x2fb   :  { %4558 = vmatprep.mubr.msk.f32.mxu0 %vm5160_vm5, %v5159_v47 }
 0x2fd   :  { %v359_v59 = vpop.permute.xlu1 %358 }
 0x2fe   :  { %4552 = vmatpush3.xpose.msk.msra.mxu1 %vm283_vm6, %v359_v59 }
 0x2ff   :  { %4561 = vmatprep.subr.mxu1 %v5159_v47 }
 0x301   :  { %4554 = vmatmul.mubr.msk.f32.vlgmr.msra.gmra.mrb[0].mxu1 %vm283_vm6, %v5347_v49 }
 0x302   :  { %4563 = vmatprep.mubr.msk.f32.mxu1 %vm5160_vm5, %v5159_v47 }
 0x360   :  { %v511_v60 = vpop.permute.xlu1 %510 }
 0x361   :  { %4562 = vmatpush3.xpose.msk.msra.mxu1 %vm283_vm6, %v511_v60  ;;  %v435_v61 = vpop.permute.xlu0 %434 }
 0x362   :  { %4557 = vmatpush3.xpose.msk.msra.mxu0 %vm283_vm6, %v435_v61  ;;  %4571 = vmatprep.subr.mxu1 %v5159_v47 }
 0x363   :  { %4566 = vmatprep.subr.mxu0 %v5159_v47 }
 0x364   :  { %4564 = vmatmul.mubr.msk.f32.vlgmr.msra.gmra.mrb[2].mxu1 %vm283_vm6, %v5367_v52 }
 0x365   :  { %4559 = vmatmul.mubr.msk.f32.vlgmr.msra.gmra.mrb[4].mxu0 %vm283_vm6, %v5371_v53  ;;  %v587_v62 = vpop.permute.xlu0 %586  ;;  %4573 = vmatprep.mubr.msk.f32.mxu1 %vm5160_vm5, %v5159_v47 }
 0x366   :  { %4567 = vmatpush3.xpose.msk.msra.mxu0 %vm283_vm6, %v587_v62  ;;  %4568 = vmatprep.mubr.msk.f32.mxu0 %vm5160_vm5, %v5159_v47 }
 0x367   :  { %4576 = vmatprep.subr.mxu0 %v5159_v47 }
 0x368   :  { %v663_v63 = vpop.permute.xlu1 %662 }
 0x369   :  { %4569 = vmatmul.mubr.msk.f32.vlgmr.msra.gmra.mrb[6].mxu0 %vm283_vm6, %v5375_v54  ;;  %4572 = vmatpush3.xpose.msk.msra.mxu1 %vm283_vm6, %v663_v63  ;;  %v739_v2 = vpop.permute.xlu0 %738 }
 0x36a   :  { %4577 = vmatpush3.xpose.msk.msra.mxu0 %vm283_vm6, %v739_v2  ;;  %4581 = vmatprep.subr.mxu1 %v5159_v47 }
 0x36b   :  { %4578 = vmatprep.mubr.msk.f32.mxu0 %vm5160_vm5, %v5159_v47  ;;  %4586 = vmatprep.subr.mxu0 %v5159_v47 }
 0x36c   :  { %4574 = vmatmul.mubr.msk.f32.vlgmr.msra.gmra.mrb[4].mxu1 %vm283_vm6, %v5381_v56  ;;  %v815_v3 = vpop.permute.xlu1 %814 }
 0x36d   :  { %4579 = vmatmul.mubr.msk.f32.vlgmr.msra.gmra.mrb[8].mxu0 %vm283_vm6, %v5377_v55  ;;  %4582 = vmatpush3.xpose.msk.msra.mxu1 %vm283_vm6, %v815_v3 }
 0x36e   :  { %4583 = vmatprep.mubr.msk.f32.mxu1 %vm5160_vm5, %v5159_v47  ;;  %4591 = vmatprep.subr.mxu1 %v5159_v47 }
 0x36f   :  { %4588 = vmatprep.mubr.msk.f32.mxu0 %vm5160_vm5, %v5159_v47 }
 0x370   :  { %4584 = vmatmul.mubr.msk.f32.vlgmr.msra.gmra.mrb[6].mxu1 %vm283_vm6, %v5389_v58 }
 0x371   :  { %4593 = vmatprep.mubr.msk.f32.mxu1 %vm5160_vm5, %v5159_v47 }
 0x3cd   :  { %v354_v4 = vpop.f32.mrb[2].mxu0 }
 0x3ce   :  { %v4550_v5 = vpop.f32.mrb[3].mxu0  ;;  %v890_v6 = vsel %vm283_vm6, %v354_v4, -inf }
 0x3cf   :  { %891 = vmax.xlane.f32.xlu0 %v890_v6 }
 0x3d4   :  { %v430_v7 = vpop.f32.mrb[0].mxu1 }
 0x3d5   :  { %v4555_v8 = vpop.f32.mrb[1].mxu1  ;;  %v893_v9 = vsel %vm283_vm6, %v430_v7, -inf }
 0x3d6   :  { %894 = vmax.xlane.f32.xlu1 %v893_v9 }
 0x437   :  { %v582_v10 = vpop.f32.mrb[2].mxu1 }
 0x438   :  { %v506_v11 = vpop.f32.mrb[4].mxu0  ;;  %v4565_v12 = vpop.f32.mrb[3].mxu1  ;;  %v899_v13 = vsel %vm283_vm6, %v582_v10, -inf }
 0x439   :  { %900 = vmax.xlane.f32.xlu0 %v899_v13  ;;  %v4560_v14 = vpop.f32.mrb[5].mxu0  ;;  %v896_v16 = vsel %vm283_vm6, %v506_v11, -inf }
 0x43c   :  { %v5442_v15 = vpop.f32.mrb[6].mxu0 }
 0x43d   :  { %897 = vmax.xlane.f32.xlu0 %v896_v16  ;;  %v4570_v17 = vpop.f32.mrb[7].mxu0  ;;  %v902_v22 = vsel %vm283_vm6, %v5442_v15, -inf }
 0x43f   :  { %v734_v18 = vpop.f32.mrb[4].mxu1 }
 0x440   :  { %v4575_v19 = vpop.f32.mrb[5].mxu1  ;;  %v5445_v20 = vpop.f32.mrb[8].mxu0  ;;  %v905_v21 = vsel %vm283_vm6, %v734_v18, -inf }
 0x441   :  { %906 = vmax.xlane.f32.xlu1 %v905_v21  ;;  %903 = vmax.xlane.f32.xlu0 %v902_v22  ;;  %v4580_v23 = vpop.f32.mrb[9].mxu0  ;;  %v908_v27 = vsel %vm283_vm6, %v5445_v20, -inf }
 0x443   :  { %v886_v24 = vpop.f32.mrb[6].mxu1 }
 0x444   :  { %v4585_v25 = vpop.f32.mrb[7].mxu1  ;;  %v911_v26 = vsel %vm283_vm6, %v886_v24, -inf }
 0x445   :  { %912 = vmax.xlane.f32.xlu1 %v911_v26  ;;  %909 = vmax.xlane.f32.xlu0 %v908_v27 }
 0x456   :  { %1054 = vrot.lane.b32.xlu1 %v5347_v49, %s5165_s20 }
 0x45a   :  { %1130 = vrot.lane.b32.xlu1 %v5371_v53, %s5165_s20 }
 0x45b   :  { %978 = vrot.lane.b32.xlu0 %v5349_v51, %s5165_s20 }
 0x45c   :  { %v892_v28 = vpop.xlane.xlu0 %891 }
 0x45d   :  { %v914_v29 = vsub.f32 %v354_v4, %v892_v28 }
 0x45e   :  { %1206 = vrot.lane.b32.xlu1 %v5367_v52, %s5165_s20 }
 0x45f   :  { %v922_v30 = vmul.f32 1.442695, %v914_v29 }
 0x461   :  { %4922 = vpow2.f32 %v922_v30 }
 0x463   :  { %v895_v31 = vpop.xlane.xlu1 %894 }
 0x464   :  { %v915_v32 = vsub.f32 %v430_v7, %v895_v31 }
 0x466   :  { %v924_v33 = vmul.f32 1.442695, %v915_v32 }
 0x468   :  { %4924 = vpow2.f32 %v924_v33 }
 0x46b   :  { %v4923_v34 = vpop.eup %4922 }
 0x46c   :  { %v938_v35 = vsel %vm283_vm6, %v4923_v34, 0.0 }
 0x472   :  { %v5462_v36 = vpop.eup %4924 }
 0x473   :  { %v941_v37 = vsel %vm283_vm6, %v5462_v36, 0.0 }
 0x47a   :  { %939 = vadd.xlane.f32.xlu0 %v938_v35 }
 0x482   :  { %942 = vadd.xlane.f32.xlu1 %v941_v37 }
 0x4c6   :  { %v901_v38 = vpop.xlane.xlu0 %900 }
 0x4c7   :  { %v917_v39 = vsub.f32 %v582_v10, %v901_v38 }
 0x4c9   :  { %v928_v40 = vmul.f32 1.442695, %v917_v39 }
 0x4ca   :  { %v898_v41 = vpop.xlane.xlu0 %897 }
 0x4cb   :  { %4926 = vpow2.f32 %v928_v40  ;;  %v916_v42 = vsub.f32 %v506_v11, %v898_v41  ;;  %v4316_v40 = vld [vmem:[%s5912_s3 + $0x8] sm:$0xff] }
 0x4cd   :  { %v926_v43 = vmul.f32 1.442695, %v916_v42 }
 0x4ce   :  { %v907_v44 = vpop.xlane.xlu1 %906  ;;  %v904_v45 = vpop.xlane.xlu0 %903 }
 0x4cf   :  { %4928 = vpow2.f32 %v926_v43  ;;  %v919_v59 = vsub.f32 %v734_v18, %v907_v44  ;;  %v918_v60 = vsub.f32 %v5442_v15, %v904_v45  ;;  %v4319_v44 = vld [vmem:[%s5912_s3 + $0x10] sm:$0xff] }
 0x4d1   :  { %v932_v61 = vmul.f32 1.442695, %v919_v59  ;;  %v930_v63 = vmul.f32 1.442695, %v918_v60 }
 0x4d2   :  { %v913_v46 = vpop.xlane.xlu1 %912  ;;  %v910_v48 = vpop.xlane.xlu0 %909 }
 0x4d3   :  { %v921_v62 = vsub.f32 %v886_v24, %v913_v46  ;;  %4930 = vpow2.f32 %v932_v61  ;;  %v920_v3 = vsub.f32 %v5445_v20, %v910_v48 }
 0x4d4   :  { %4932 = vpow2.f32 %v930_v63 }
 0x4d5   :  { %v5466_v49 = vpop.eup %4926  ;;  %v936_v2 = vmul.f32 1.442695, %v921_v62  ;;  %v934_v4 = vmul.f32 1.442695, %v920_v3 }
 0x4d6   :  { %v1055_v50 = vpop.permute.xlu1 %1054  ;;  %v979_v51 = vpop.permute.xlu0 %978  ;;  %v947_v52 = vsel %vm283_vm6, %v5466_v49, 0.0 }
 0x4d7   :  { %4592 = vmatpush3.msra.mxu1 %v1055_v50  ;;  %948 = vadd.xlane.f32.xlu1 %v947_v52  ;;  %4934 = vpow2.f32 %v936_v2  ;;  %v4315_v2 = vld [vmem:[#allocation5] ss:$0 sm:$0xff] }
 0x4d8   :  { %4587 = vmatpush3.msra.mxu0 %v979_v51  ;;  %4601 = vmatprep.subr.mxu1 %v5159_v47  ;;  %4936 = vpow2.f32 %v934_v4  ;;  %v4322_v51 = vld [vmem:[%s5912_s3 + $0x18] sm:$0xff] }
 0x4d9   :  { %v4929_v53 = vpop.eup %4928  ;;  %4596 = vmatprep.subr.mxu0 %v5159_v47 }
 0x4da   :  { %v944_v57 = vsel %vm283_vm6, %v4929_v53, 0.0  ;;  %v1131_v5 = vpop.permute.xlu1 %1130 }
 0x4db   :  { %945 = vadd.xlane.f32.xlu0 %v944_v57 }
 0x4e8   :  { %1358 = vrot.lane.b32.xlu1 %v5381_v56, %s5165_s20  ;;  %v4931_v56 = vpop.eup %4930 }
 0x4e9   :  { %v5479_v7 = vpop.eup %4932  ;;  %v953_v8 = vsel %vm283_vm6, %v4931_v56, 0.0 }
 0x4ea   :  { %v4935_v9 = vpop.eup %4934  ;;  %v950_v12 = vsel %vm283_vm6, %v5479_v7, 0.0 }
 0x4eb   :  { %v959_v11 = vsel %vm283_vm6, %v4935_v9, 0.0  ;;  %v4937_v13 = vpop.eup %4936 }
 0x4ec   :  { %v956_v16 = vsel %vm283_vm6, %v4937_v13, 0.0 }
 0x4f1   :  { %1282 = vrot.lane.b32.xlu0 %v5375_v54, %s5165_s20  ;;  %v1207_v54 = vpop.permute.xlu1 %1206 }
 0x507   :  { %v940_v6 = vpop.xlane.xlu0 %939 }
 0x508   :  { %4938 = vrcp.f32 %v940_v6 }
 0x50c   :  { %954 = vadd.xlane.f32.xlu1 %v953_v8 }
 0x50f   :  { %v943_v10 = vpop.xlane.xlu1 %942 }
 0x510   :  { %4940 = vrcp.f32 %v943_v10  ;;  %960 = vadd.xlane.f32.xlu1 %v959_v11  ;;  %951 = vadd.xlane.f32.xlu0 %v950_v12 }
 0x512   :  { %v4939_v14 = vpop.eup %4938 }
 0x513   :  { %v970_v15 = vmul.f32 %v4939_v14, %v4923_v34 }
 0x514   :  { %957 = vadd.xlane.f32.xlu0 %v956_v16 }
 0x515   :  { %4589 = vmatmul.mubr.msk.f32.vlgmr.msra.gmra.mrb[10].mxu0 %vm283_vm6, %v970_v15 }
 0x516   :  { %4597 = vmatpush3.msra.mxu0 %v1131_v5  ;;  %4598 = vmatprep.mubr.msk.f32.mxu0 %vm5160_vm5, %v5159_v47 }
 0x517   :  { %4606 = vmatprep.subr.mxu0 %v5159_v47 }
 0x51a   :  { %v4941_v17 = vpop.eup %4940 }
 0x51b   :  { %v971_v18 = vmul.f32 %v4941_v17, %v5462_v36  ;;  %v1587_v36 = vld [vmem:[%s5912_s3] sm:$0xff] }
 0x51c   :  { %v1992_v17 = vld [vmem:[%s5916_s7] sm:$0xff] }
 0x51d   :  { %4594 = vmatmul.mubr.msk.f32.vlgmr.msra.gmra.mrb[8].mxu1 %vm283_vm6, %v971_v18  ;;  %v1993_v18 = vld [vmem:[%s5916_s7 + $0x8] sm:$0xff] }
 0x51e   :  { %4602 = vmatpush3.msra.mxu1 %v1207_v54  ;;  %4603 = vmatprep.mubr.msk.f32.mxu1 %vm5160_vm5, %v5159_v47 }
 0x51f   :  { %4611 = vmatprep.subr.mxu1 %v5159_v47 }
 0x521   :  { %1510 = vrot.lane.b32.xlu1 %v5389_v58, %s5165_s20 }
 0x52a   :  { %1434 = vrot.lane.b32.xlu0 %v5377_v55, %s5165_s20 }
 0x564   :  { %v949_v19 = vpop.xlane.xlu1 %948 }
 0x565   :  { %4942 = vrcp.f32 %v949_v19  ;;  %v1994_v19 = vld [vmem:[%s5916_s7 + $0x10] sm:$0xff] }
 0x568   :  { %v946_v20 = vpop.xlane.xlu0 %945  ;;  %v1359_v23 = vpop.permute.xlu1 %1358 }
 0x569   :  { %4944 = vrcp.f32 %v946_v20  ;;  %v4825_v20 = vpack.c.bf16 %v1993_v18, %v1992_v17 }
 0x56c   :  { %v1283_v58 = vpop.permute.xlu0 %1282 }
 0x56f   :  { %v4943_v21 = vpop.eup %4942 }
 0x570   :  { %v973_v22 = vmul.f32 %v4943_v21, %v5466_v49  ;;  %v1995_v21 = vld [vmem:[%s5916_s7 + $0x18] sm:$0xff] }
 0x572   :  { %4604 = vmatmul.mubr.msk.f32.vlgmr.msra.gmra.mrb[10].mxu1 %vm283_vm6, %v973_v22  ;;  %v4829_v22 = vpack.c.bf16 %v1995_v21, %v1994_v19 }
 0x573   :  { %v4945_v24 = vpop.eup %4944  ;;  %4612 = vmatpush3.msra.mxu1 %v1359_v23  ;;  %4613 = vmatprep.mubr.msk.f32.mxu1 %vm5160_vm5, %v5159_v47  ;;  %v2086_v23 = vld [vmem:[%s5918_s9] sm:$0xff] }
 0x574   :  { %v972_v25 = vmul.f32 %v4945_v24, %v4929_v53  ;;  %4621 = vmatprep.subr.mxu1 %v5159_v47  ;;  %v2087_v24 = vld [vmem:[%s5918_s9 + $0x8] sm:$0xff] }
 0x576   :  { %4599 = vmatmul.mubr.msk.f32.vlgmr.msra.gmra.mrb[12].mxu0 %vm283_vm6, %v972_v25  ;;  %v4833_v25 = vpack.c.bf16 %v2087_v24, %v2086_v23  ;;  %v4335_v24 = vld [vmem:[%s5910_s1 + $0x20] sm:$0xff] }
 0x577   :  { %4607 = vmatpush3.msra.mxu0 %v1283_v58  ;;  %4608 = vmatprep.mubr.msk.f32.mxu0 %vm5160_vm5, %v5159_v47 }
 0x578   :  { %4616 = vmatprep.subr.mxu0 %v5159_v47 }
 0x599   :  { %v955_v55 = vpop.xlane.xlu1 %954 }
 0x59a   :  { %4946 = vrcp.f32 %v955_v55 }
 0x59d   :  { %v961_v26 = vpop.xlane.xlu1 %960  ;;  %v952_v27 = vpop.xlane.xlu0 %951 }
 0x59e   :  { %4948 = vrcp.f32 %v961_v26 }
 0x59f   :  { %4950 = vrcp.f32 %v952_v27 }
 0x5a1   :  { %v958_v28 = vpop.xlane.xlu0 %957  ;;  %v1511_v31 = vpop.permute.xlu1 %1510 }
 0x5a2   :  { %4952 = vrcp.f32 %v958_v28 }
 0x5a4   :  { %v4947_v29 = vpop.eup %4946 }
 0x5a5   :  { %v975_v30 = vmul.f32 %v4947_v29, %v4931_v56  ;;  %v1435_v38 = vpop.permute.xlu0 %1434 }
 0x5a7   :  { %4614 = vmatmul.mubr.msk.f32.vlgmr.msra.gmra.mrb[12].mxu1 %vm283_vm6, %v975_v30 }
 0x5a8   :  { %v4949_v32 = vpop.eup %4948  ;;  %4622 = vmatpush3.msra.mxu1 %v1511_v31  ;;  %4623 = vmatprep.mubr.msk.f32.mxu1 %vm5160_vm5, %v5159_v47 }
 0x5a9   :  { %v4951_v33 = vpop.eup %4950  ;;  %v977_v34 = vmul.f32 %v4949_v32, %v4935_v9  ;;  %4826 = vmatprep.subr.bf16.mxu1 %v4825_v20 }
 0x5aa   :  { %v974_v35 = vmul.f32 %v4951_v33, %v5479_v7 }
 0x5ab   :  { %4624 = vmatmul.mubr.msk.f32.vlgmr.msra.gmra.mrb[14].mxu1 %vm283_vm6, %v977_v34 }
 0x5ac   :  { %v4953_v37 = vpop.eup %4952  ;;  %4609 = vmatmul.mubr.msk.f32.vlgmr.msra.gmra.mrb[14].mxu0 %vm283_vm6, %v974_v35  ;;  %4828 = vmatpush3.bf16.msra.mxu1 %v4825_v20 }
 0x5ad   :  { %v976_v39 = vmul.f32 %v4953_v37, %v4937_v13  ;;  %4617 = vmatpush3.msra.mxu0 %v1435_v38  ;;  %4618 = vmatprep.mubr.msk.f32.mxu0 %vm5160_vm5, %v5159_v47 }
 0x5ae   :  { %4626 = vmatprep.subr.mxu0 %v1587_v36  ;;  %4830 = vmatprep.subr.bf16.mxu1 %v4829_v22 }
 0x5b0   :  { %4619 = vmatmul.mubr.msk.f32.vlgmr.msra.gmra.mrb[16].mxu0 %vm283_vm6, %v976_v39  ;;  %4832 = vmatpush3.bf16.msra.mxu1 %v4829_v22 }
 0x5b1   :  { %4627 = vmatpush3.msra.mxu0 %v1587_v36  ;;  %4834 = vmatprep.subr.bf16.mxu1 %v4833_v25 }
 0x5b2   :  { %4631 = vmatprep.subr.mxu0 %v4316_v40 }
 0x5e8   :  { %v1050_v41 = vpop.f32.mrb[10].mxu0 }
 0x5e9   :  { %v4590_v42 = vpop.f32.mrb[11].mxu0  ;;  %4628 = vmatprep.mubr.msk.f32.mxu0 %vm283_vm6, %v1050_v41 }
 0x5f0   :  { %v1126_v43 = vpop.f32.mrb[8].mxu1 }
 0x5f1   :  { %v4595_v45 = vpop.f32.mrb[9].mxu1  ;;  %4629 = vmatmul.mubr.msk.f32.vlgmr.msra.gmra.mrb[18].mxu0 %vm283_vm6, %v1126_v43  ;;  %v4326_v43 = vld [vmem:[%s5921_s12] ss:$0 sm:$0xff] }
 0x5f2   :  { %4632 = vmatpush3.msra.mxu0 %v4316_v40  ;;  %v4325_v40 = vld [vmem:[%s5920_s11] ss:$0 sm:$0xff] }
 0x5f3   :  { %4636 = vmatprep.subr.mxu0 %v4319_v44 }
 0x645   :  { %v1278_v46 = vpop.f32.mrb[10].mxu1 }
 0x646   :  { %v4605_v48 = vpop.f32.mrb[11].mxu1 }
 0x649   :  { %v1202_v49 = vpop.f32.mrb[12].mxu0 }
 0x64a   :  { %v4600_v50 = vpop.f32.mrb[13].mxu0  ;;  %4633 = vmatprep.mubr.msk.f32.mxu0 %vm283_vm6, %v1202_v49  ;;  %v2088_v49 = vld [vmem:[%s5918_s9 + $0x10] sm:$0xff] }
 0x64b   :  { %4634 = vmatmul.mubr.msk.f32.vlgmr.msra.gmra.mrb[18].mxu0 %vm283_vm6, %v1278_v46  ;;  %v2089_v50 = vld [vmem:[%s5918_s9 + $0x18] sm:$0xff] }
 0x64c   :  { %4637 = vmatpush3.msra.mxu0 %v4319_v44 }
 0x64d   :  { %4641 = vmatprep.subr.mxu0 %v4322_v51 }
 0x67a   :  { %v1430_v52 = vpop.f32.mrb[12].mxu1 }
 0x67b   :  { %v4615_v53 = vpop.f32.mrb[13].mxu1 }
 0x67c   :  { %v4837_v53 = vpack.c.bf16 %v2089_v50, %v2088_v49  ;;  %v4334_v50 = vld [vmem:[#allocation8 + $0x1] ss:$0 sm:$0xff] }
 0x67e   :  { %v1582_v57 = vpop.f32.mrb[14].mxu1 }
 0x67f   :  { %v1354_v59 = vpop.f32.mrb[14].mxu0  ;;  %v4625_v60 = vpop.f32.mrb[15].mxu1 }
 0x680   :  { %v4610_v61 = vpop.f32.mrb[15].mxu0  ;;  %4638 = vmatprep.mubr.msk.f32.mxu0 %vm283_vm6, %v1354_v59  ;;  %v2091_v59 = vld [vmem:[%s5918_s9 + $0x28] sm:$0xff] }
 0x681   :  { %4639 = vmatmul.mubr.msk.f32.vlgmr.msra.gmra.mrb[18].mxu0 %vm283_vm6, %v1430_v52  ;;  %v2092_v61 = vld [vmem:[%s5918_s9 + $0x30] sm:$0xff] }
 0x682   :  { %4642 = vmatpush3.msra.mxu0 %v4322_v51 }
 0x683   :  { %v1506_v62 = vpop.f32.mrb[16].mxu0 }
 0x684   :  { %v4620_v63 = vpop.f32.mrb[17].mxu0  ;;  %4643 = vmatprep.mubr.msk.f32.mxu0 %vm283_vm6, %v1506_v62  ;;  %v2093_v62 = vld [vmem:[%s5918_s9 + $0x38] sm:$0xff] }
 0x685   :  { %v4845_v63 = vpack.c.bf16 %v2093_v62, %v2092_v61 }
 0x689   :  { %4644 = vmatmul.mubr.msk.f32.vlgmr.msra.gmra.mrb[18].mxu0 %vm283_vm6, %v1582_v57  ;;  %v2090_v57 = vld [vmem:[%s5918_s9 + $0x20] sm:$0xff] }
 0x68a   :  { %v4841_v60 = vpack.c.bf16 %v2091_v59, %v2090_v57  ;;  %v4340_v59 = vld [vmem:[%s5911_s2 + $0x1] ss:$0 sm:$0xff] }
 0x75c   :  { %v4645_v3 = vpop.f32.mrb[18].mxu0 }
 0x75d   :  { %v4881_v4 = vadd.f32 %v4645_v3, %v4315_v2  ;;  %v1921_v5 = vpop.f32.mrb[19].mxu0 }
 0x75e   :  { %v4882_v6 = vadd.f32 %v4315_v2, %v1921_v5  ;;  %v4327_v2 = vld [vmem:[#allocation10] ss:$0 sm:$0xff] }
 0x75f   :  { %v5538_v56 = vadd.f32 %v4881_v4, %v5314_v1 }
 0x760   :  { %v5541_v7 = vadd.f32 %v4882_v6, %v5312_v0 }
 0x761   :  { %v1939_v54 = vsel %vm117_vm0, %v5538_v56, 0.0 }
 0x762   :  { %1940 = vadd.xlane.f32.xlu1 %v1939_v54  ;;  %v1936_v8 = vsel %vm117_vm0, %v5541_v7, 0.0 }
 0x763   :  { %1937 = vadd.xlane.f32.xlu0 %v1936_v8 }
 0x7ef   :  { %v1941_v9 = vpop.xlane.xlu1 %1940 }
 0x7f0   :  { %v1943_v10 = vmul.f32 0.03125, %v1941_v9  ;;  %v1938_v11 = vpop.xlane.xlu0 %1937  ;;  %v4330_v9 = vld [vmem:[%s5919_s10] ss:$0 sm:$0xff] }
 0x7f1   :  { %v1942_v12 = vmul.f32 0.03125, %v1938_v11 }
 0x7f2   :  { %v1945_v13 = vsub.f32 %v5538_v56, %v1943_v10 }
 0x7f3   :  { %v1944_v1 = vsub.f32 %v5541_v7, %v1942_v12 }
 0x7f4   :  { %v1947_v15 = vmul.f32 %v1945_v13, %v1945_v13  ;;  %v1981_v45 = vmul.f32 %v4325_v40, %v1945_v13 }
 0x7f5   :  { %v1946_v14 = vmul.f32 %v1944_v1, %v1944_v1  ;;  %v1980_v41 = vmul.f32 %v4325_v40, %v1944_v1 }
 0x7f6   :  { %v1951_v16 = vsel %vm117_vm0, %v1947_v15, 0.0 }
 0x7f7   :  { %v1948_v0 = vsel %vm117_vm0, %v1946_v14, 0.0 }
 0x7f8   :  { %1949 = vadd.xlane.f32.xlu0 %v1948_v0 }
 0x7fc   :  { %1952 = vadd.xlane.f32.xlu0 %v1951_v16 }
 0x885   :  { %v1950_v58 = vpop.xlane.xlu0 %1949 }
 0x886   :  { %v1954_v55 = vmul.f32 0.03125, %v1950_v58  ;;  %v4337_v58 = vld [vmem:[%s5910_s1 + $0x30] sm:$0xff] }
 0x888   :  { %4954 = vrsqrt.f32 %v1954_v55  ;;  %vm1958_vm7 = vcmp.eq.f32.partialorder %v1954_v55, inf  ;;  %v1961_v30 = vand.u32 2147483648, %v1954_v55  ;;  %vm1960_vm8 = vcmp.eq.f32.partialorder %v1954_v55, 0.0 }
 0x889   :  { %v1953_v26 = vpop.xlane.xlu0 %1952 }
 0x88a   :  { %v1955_v27 = vmul.f32 0.03125, %v1953_v26  ;;  %v4338_v26 = vld [vmem:[%s5910_s1 + $0x38] sm:$0xff] }
 0x88c   :  { %4956 = vrsqrt.f32 %v1955_v27  ;;  %vm1965_vm9 = vcmp.eq.f32.partialorder %v1955_v27, inf  ;;  %v1968_v36 = vand.u32 2147483648, %v1955_v27  ;;  %vm1967_vm10 = vcmp.eq.f32.partialorder %v1955_v27, 0.0 }
 0x892   :  { %v4955_v28 = vpop.eup %4954 }
 0x893   :  { %v1957_v29 = vmul.f32 %v4955_v28, %v1954_v55 }
 0x895   :  { %v1959_v31 = vsel %vm1958_vm7, %v1954_v55, %v1957_v29 }
 0x896   :  { %v4957_v32 = vpop.eup %4956  ;;  %v1962_v33 = vsel %vm1960_vm8, %v1961_v30, %v1959_v31 }
 0x897   :  { %v1964_v34 = vmul.f32 %v4957_v32, %v1955_v27  ;;  %v1970_v35 = vadd.f32 1e-06, %v1962_v33 }
 0x899   :  { %v1966_v37 = vsel %vm1965_vm9, %v1955_v27, %v1964_v34  ;;  %4958 = vrcp.f32 %v1970_v35  ;;  %v4853_v27 = vpack.c.bf16 %v4338_v26, %v4337_v58 }
 0x89a   :  { %v1969_v38 = vsel %vm1967_vm10, %v1968_v36, %v1966_v37 }
 0x89b   :  { %v1971_v39 = vadd.f32 1e-06, %v1969_v38 }
 0x89d   :  { %4960 = vrcp.f32 %v1971_v39 }
 0x8a3   :  { %v4959_v42 = vpop.eup %4958 }
 0x8a4   :  { %v1982_v44 = vmul.f32 %v4959_v42, %v1980_v41 }
 0x8a6   :  { %v1990_v46 = vadd.f32 %v4326_v43, %v1982_v44  ;;  %v4333_v44 = vld [vmem:[#allocation7 + $0x1] ss:$0 sm:$0xff] }
 0x8a7   :  { %v4961_v48 = vpop.eup %4960 }
 0x8a8   :  { %v1983_v51 = vmul.f32 %v4961_v48, %v1981_v45  ;;  %4654 = vmatprep.mubr.msk.f32.mxu1 %vm117_vm0, %v1990_v46 }
 0x8aa   :  { %v1991_v52 = vadd.f32 %v4326_v43, %v1983_v51 }
 0x8ac   :  { %4655 = vmatmul.mubr.msk.f32.vlgmr.msra.gmra.mrb[16].mxu1 %vm117_vm0, %v1991_v52 }
 0x8ad   :  { %4836 = vmatpush3.bf16.msra.mxu1 %v4833_v25  ;;  %v4336_v25 = vld [vmem:[%s5910_s1 + $0x28] sm:$0xff] }
 0x8ae   :  { %4838 = vmatprep.subr.bf16.mxu1 %v4837_v53  ;;  %v4849_v55 = vpack.c.bf16 %v4336_v25, %v4335_v24 }
 0x8b0   :  { %4850 = vmatprep.subr.bf16.mxu0 %v4849_v55 }
 0x8b1   :  { %4840 = vmatpush3.bf16.msra.mxu1 %v4837_v53  ;;  %4852 = vmatpush3.bf16.msra.mxu0 %v4849_v55 }
 0x8b2   :  { %4842 = vmatprep.subr.bf16.mxu1 %v4841_v60  ;;  %4854 = vmatprep.subr.bf16.mxu0 %v4853_v27 }
 0x8b5   :  { %4844 = vmatpush3.bf16.msra.mxu1 %v4841_v60  ;;  %4856 = vmatpush3.bf16.msra.mxu0 %v4853_v27 }
 0x8b6   :  { %4846 = vmatprep.subr.bf16.mxu1 %v4845_v63  ;;  %4687 = vmatprep.subr.mxu0 %v5159_v47 }
 0x8b9   :  { %4848 = vmatpush3.bf16.msra.mxu1 %v4845_v63 }
 0x8ba   :  { %4692 = vmatprep.subr.mxu1 %v5159_v47 }
 0x97f   :  { %v4656_v3 = vpop.f32.mrb[16].mxu1 }
 0x980   :  { %v2081_v4 = vadd.f32 %v4656_v3, %v4327_v2  ;;  %v2075_v5 = vpop.f32.mrb[17].mxu1 }
 0x981   :  { %v2076_v6 = vadd.f32 %v4327_v2, %v2075_v5 }
 0x982   :  { %v2085_v8 = vmax.f32 %v2081_v4, 0.0 }
 0x983   :  { %v2084_v54 = vmax.f32 %v2076_v6, 0.0 }
 0x985   :  { %4673 = vmatprep.mubr.msk.f32.mxu1 %vm2101_vm11, %v2084_v54 }
 0x986   :  { %4674 = vmatmul.mubr.msk.f32.vlgmr.msra.gmra.mrb[18].mxu1 %vm2101_vm11, %v2085_v8 }
 0x987   :  { %4694 = vmatprep.mubr.msk.f32.mxu1 %vm5160_vm5, %v5159_v47 }
 0xa59   :  { %v4675_v10 = vpop.f32.mrb[18].mxu1 }
 0xa5a   :  { %v2180_v11 = vadd.f32 %v4675_v10, %v4330_v9  ;;  %v2174_v12 = vpop.f32.mrb[19].mxu1 }
 0xa5b   :  { %v2175_v13 = vadd.f32 %v4330_v9, %v2174_v12 }
 0xa5c   :  { %v5604_v1 = vadd.f32 %v2180_v11, %v5538_v56 }
 0xa5d   :  { %v5607_v14 = vadd.f32 %v2175_v13, %v5541_v7 }
 0xa5e   :  { %v2192_v0 = vsel %vm117_vm0, %v5604_v1, 0.0 }
 0xa5f   :  { %2193 = vadd.xlane.f32.xlu1 %v2192_v0  ;;  %v2189_v15 = vsel %vm117_vm0, %v5607_v14, 0.0 }
 0xa60   :  { %2190 = vadd.xlane.f32.xlu0 %v2189_v15 }
 0xaec   :  { %v2194_v16 = vpop.xlane.xlu1 %2193 }
 0xaed   :  { %v2196_v17 = vmul.f32 0.03125, %v2194_v16  ;;  %v2191_v18 = vpop.xlane.xlu0 %2190 }
 0xaee   :  { %v2195_v19 = vmul.f32 0.03125, %v2191_v18 }
 0xaef   :  { %v2198_v20 = vsub.f32 %v5604_v1, %v2196_v17 }
 0xaf0   :  { %v2197_v56 = vsub.f32 %v5607_v14, %v2195_v19 }
 0xaf1   :  { %v2200_v21 = vmul.f32 %v2198_v20, %v2198_v20  ;;  %v2234_v45 = vmul.f32 %v4333_v44, %v2198_v20 }
 0xaf2   :  { %v2199_v22 = vmul.f32 %v2197_v56, %v2197_v56  ;;  %v2233_v48 = vmul.f32 %v4333_v44, %v2197_v56 }
 0xaf3   :  { %v2204_v7 = vsel %vm117_vm0, %v2200_v21, 0.0 }
 0xaf4   :  { %2205 = vadd.xlane.f32.xlu1 %v2204_v7  ;;  %v2201_v23 = vsel %vm117_vm0, %v2199_v22, 0.0 }
 0xaf5   :  { %2202 = vadd.xlane.f32.xlu0 %v2201_v23 }
 0xb81   :  { %v2206_v28 = vpop.xlane.xlu1 %2205 }
 0xb82   :  { %v2208_v29 = vmul.f32 0.03125, %v2206_v28  ;;  %v2203_v30 = vpop.xlane.xlu0 %2202 }
 0xb83   :  { %v2207_v31 = vmul.f32 0.03125, %v2203_v30 }
 0xb84   :  { %4962 = vrsqrt.f32 %v2208_v29  ;;  %vm2218_vm12 = vcmp.eq.f32.partialorder %v2208_v29, inf  ;;  %v2221_v35 = vand.u32 2147483648, %v2208_v29  ;;  %vm2220_vm13 = vcmp.eq.f32.partialorder %v2208_v29, 0.0 }
 0xb85   :  { %4964 = vrsqrt.f32 %v2207_v31  ;;  %vm2211_vm14 = vcmp.eq.f32.partialorder %v2207_v31, inf  ;;  %v2214_v38 = vand.u32 2147483648, %v2207_v31  ;;  %vm2213_vm15 = vcmp.eq.f32.partialorder %v2207_v31, 0.0 }
 0xb8e   :  { %v4963_v32 = vpop.eup %4962 }
 0xb8f   :  { %v4965_v33 = vpop.eup %4964  ;;  %v2217_v34 = vmul.f32 %v4963_v32, %v2208_v29 }
 0xb90   :  { %v2210_v36 = vmul.f32 %v4965_v33, %v2207_v31 }
 0xb91   :  { %v2219_v37 = vsel %vm2218_vm12, %v2208_v29, %v2217_v34 }
 0xb92   :  { %v2222_v39 = vsel %vm2220_vm13, %v2221_v35, %v2219_v37  ;;  %v2212_v40 = vsel %vm2211_vm14, %v2207_v31, %v2210_v36 }
 0xb93   :  { %v2224_v41 = vadd.f32 1e-06, %v2222_v39  ;;  %v2215_v42 = vsel %vm2213_vm15, %v2214_v38, %v2212_v40 }
 0xb94   :  { %v2223_v43 = vadd.f32 1e-06, %v2215_v42 }
 0xb95   :  { %4966 = vrcp.f32 %v2224_v41 }
 0xb96   :  { %4968 = vrcp.f32 %v2223_v43 }
 0xb9f   :  { %v4967_v46 = vpop.eup %4966 }
 0xba0   :  { %v4969_v49 = vpop.eup %4968  ;;  %v2236_v51 = vmul.f32 %v4967_v46, %v2234_v45 }
 0xba1   :  { %v2235_v52 = vmul.f32 %v4969_v49, %v2233_v48 }
 0xba2   :  { %v2244_v57 = vadd.f32 %v4334_v50, %v2236_v51 }
 0xba3   :  { %v2243_v53 = vadd.f32 %v4334_v50, %v2235_v52 }
 0xba5   :  { %4684 = vmatprep.mubr.msk.f32.mxu0 %vm117_vm0, %v2243_v53 }
 0xba6   :  { %4685 = vmatmul.mubr.msk.f32.vlgmr.msra.gmra.mrb[20].mxu0 %vm117_vm0, %v2244_v57 }
 0xba7   :  { %4689 = vmatprep.mubr.msk.f32.mxu0 %vm5160_vm5, %v5159_v47 }
 0xc79   :  { %v4686_v60 = vpop.f32.mrb[20].mxu0 }
 0xc7a   :  { %v5637_v61 = vadd.f32 %v4686_v60, %v4340_v59  ;;  %v2330_v62 = vpop.f32.mrb[21].mxu0 }
 0xc7b   :  { %v5639_v63 = vadd.f32 %v4340_v59, %v2330_v62 }
 0xc7c   :  { %2343 = vrot.lane.b32.xlu1 %v5637_v61, %s5161_s14 }
 0xc7d   :  { %2341 = vrot.lane.b32.xlu0 %v5639_v63, %s5161_s14 }
 0xc80   :  { %2345 = vrot.lane.b32.xlu1 %v5639_v63, %s5162_s15 }
 0xc81   :  { %2349 = vrot.lane.b32.xlu0 %v5639_v63, %s5163_s16 }
 0xc84   :  { %2347 = vrot.lane.b32.xlu1 %v5637_v61, %s5162_s15 }
 0xc85   :  { %2353 = vrot.lane.b32.xlu0 %v5639_v63, %s5164_s26 }
 0xc88   :  { %2351 = vrot.lane.b32.xlu1 %v5637_v61, %s5163_s16 }
 0xc8c   :  { %2429 = vrot.lane.b32.xlu1 %v5637_v61, %s5164_s26 }
 0xcee   :  { %v5657_v2 = vpop.permute.xlu1 %2343 }
 0xcef   :  { %2581 = vrot.lane.b32.xlu1 %v5657_v2, %s5164_s26  ;;  %v5661_v3 = vpop.permute.xlu0 %2341 }
 0xcf0   :  { %2505 = vrot.lane.b32.xlu0 %v5661_v3, %s5164_s26 }
 0xcf2   :  { %v5665_v4 = vpop.permute.xlu1 %2345 }
 0xcf3   :  { %v5667_v5 = vpop.permute.xlu0 %2349 }
 0xcf4   :  { %2657 = vrot.lane.b32.xlu0 %v5665_v4, %s5164_s26 }
 0xcf6   :  { %v5671_v6 = vpop.permute.xlu1 %2347 }
 0xcf7   :  { %2733 = vrot.lane.b32.xlu1 %v5671_v6, %s5164_s26  ;;  %v2354_v54 = vpop.permute.xlu0 %2353 }
 0xcf8   :  { %2809 = vrot.lane.b32.xlu0 %v5667_v5, %s5164_s26  ;;  %4688 = vmatpush3.xpose.msk.msra.mxu0 %vm283_vm6, %v2354_v54 }
 0xcf9   :  { %4697 = vmatprep.subr.mxu0 %v5159_v47 }
 0xcfa   :  { %v5679_v8 = vpop.permute.xlu1 %2351 }
 0xcfb   :  { %2885 = vrot.lane.b32.xlu1 %v5679_v8, %s5164_s26  ;;  %4690 = vmatmul.mubr.msk.f32.vlgmr.msra.gmra.mrb[22].mxu0 %vm283_vm6, %v5639_v63 }
 0xcfc   :  { %4699 = vmatprep.mubr.msk.f32.mxu0 %vm5160_vm5, %v5159_v47 }
 0xcfe   :  { %v2430_v9 = vpop.permute.xlu1 %2429 }
 0xcff   :  { %4693 = vmatpush3.xpose.msk.msra.mxu1 %vm283_vm6, %v2430_v9 }
 0xd00   :  { %4702 = vmatprep.subr.mxu1 %v5159_v47 }
 0xd02   :  { %4695 = vmatmul.mubr.msk.f32.vlgmr.msra.gmra.mrb[20].mxu1 %vm283_vm6, %v5637_v61 }
 0xd03   :  { %4704 = vmatprep.mubr.msk.f32.mxu1 %vm5160_vm5, %v5159_v47 }
 0xd61   :  { %v2582_v10 = vpop.permute.xlu1 %2581 }
 0xd62   :  { %4703 = vmatpush3.xpose.msk.msra.mxu1 %vm283_vm6, %v2582_v10  ;;  %v2506_v11 = vpop.permute.xlu0 %2505 }
 0xd63   :  { %4698 = vmatpush3.xpose.msk.msra.mxu0 %vm283_vm6, %v2506_v11  ;;  %4712 = vmatprep.subr.mxu1 %v5159_v47 }
 0xd64   :  { %4707 = vmatprep.subr.mxu0 %v5159_v47 }
 0xd65   :  { %4705 = vmatmul.mubr.msk.f32.vlgmr.msra.gmra.mrb[22].mxu1 %vm283_vm6, %v5657_v2 }
 0xd66   :  { %4700 = vmatmul.mubr.msk.f32.vlgmr.msra.gmra.mrb[24].mxu0 %vm283_vm6, %v5661_v3  ;;  %v2658_v12 = vpop.permute.xlu0 %2657  ;;  %4714 = vmatprep.mubr.msk.f32.mxu1 %vm5160_vm5, %v5159_v47 }
 0xd67   :  { %4708 = vmatpush3.xpose.msk.msra.mxu0 %vm283_vm6, %v2658_v12  ;;  %4709 = vmatprep.mubr.msk.f32.mxu0 %vm5160_vm5, %v5159_v47 }
 0xd68   :  { %4717 = vmatprep.subr.mxu0 %v5159_v47 }
 0xd69   :  { %v2734_v13 = vpop.permute.xlu1 %2733 }
 0xd6a   :  { %4710 = vmatmul.mubr.msk.f32.vlgmr.msra.gmra.mrb[26].mxu0 %vm283_vm6, %v5665_v4  ;;  %4713 = vmatpush3.xpose.msk.msra.mxu1 %vm283_vm6, %v2734_v13  ;;  %v2810_v0 = vpop.permute.xlu0 %2809 }
 0xd6b   :  { %4718 = vmatpush3.xpose.msk.msra.mxu0 %vm283_vm6, %v2810_v0  ;;  %4722 = vmatprep.subr.mxu1 %v5159_v47 }
 0xd6c   :  { %4719 = vmatprep.mubr.msk.f32.mxu0 %vm5160_vm5, %v5159_v47  ;;  %4727 = vmatprep.subr.mxu0 %v5159_v47 }
 0xd6d   :  { %4715 = vmatmul.mubr.msk.f32.vlgmr.msra.gmra.mrb[24].mxu1 %vm283_vm6, %v5671_v6  ;;  %v2886_v15 = vpop.permute.xlu1 %2885 }
 0xd6e   :  { %4720 = vmatmul.mubr.msk.f32.vlgmr.msra.gmra.mrb[28].mxu0 %vm283_vm6, %v5667_v5  ;;  %4723 = vmatpush3.xpose.msk.msra.mxu1 %vm283_vm6, %v2886_v15 }
 0xd6f   :  { %4724 = vmatprep.mubr.msk.f32.mxu1 %vm5160_vm5, %v5159_v47  ;;  %4732 = vmatprep.subr.mxu1 %v5159_v47 }
 0xd70   :  { %4729 = vmatprep.mubr.msk.f32.mxu0 %vm5160_vm5, %v5159_v47 }
 0xd71   :  { %4725 = vmatmul.mubr.msk.f32.vlgmr.msra.gmra.mrb[26].mxu1 %vm283_vm6, %v5679_v8 }
 0xd72   :  { %4734 = vmatprep.mubr.msk.f32.mxu1 %vm5160_vm5, %v5159_v47 }
 0xdce   :  { %v2425_v16 = vpop.f32.mrb[22].mxu0 }
 0xdcf   :  { %v4691_v17 = vpop.f32.mrb[23].mxu0  ;;  %v2961_v18 = vsel %vm283_vm6, %v2425_v16, -inf }
 0xdd0   :  { %2962 = vmax.xlane.f32.xlu0 %v2961_v18 }
 0xdd5   :  { %v2501_v19 = vpop.f32.mrb[20].mxu1 }
 0xdd6   :  { %v4696_v20 = vpop.f32.mrb[21].mxu1  ;;  %v2964_v56 = vsel %vm283_vm6, %v2501_v19, -inf }
 0xdd7   :  { %2965 = vmax.xlane.f32.xlu1 %v2964_v56 }
 0xe38   :  { %v2653_v21 = vpop.f32.mrb[22].mxu1 }
 0xe39   :  { %v2577_v22 = vpop.f32.mrb[24].mxu0  ;;  %v4706_v7 = vpop.f32.mrb[23].mxu1  ;;  %v2970_v23 = vsel %vm283_vm6, %v2653_v21, -inf }
 0xe3a   :  { %2971 = vmax.xlane.f32.xlu0 %v2970_v23  ;;  %v4701_v24 = vpop.f32.mrb[25].mxu0  ;;  %v2967_v58 = vsel %vm283_vm6, %v2577_v22, -inf }
 0xe3d   :  { %v5732_v25 = vpop.f32.mrb[26].mxu0 }
 0xe3e   :  { %2968 = vmax.xlane.f32.xlu0 %v2967_v58  ;;  %v4711_v55 = vpop.f32.mrb[27].mxu0  ;;  %v2973_v30 = vsel %vm283_vm6, %v5732_v25, -inf }
 0xe40   :  { %v2805_v26 = vpop.f32.mrb[24].mxu1 }
 0xe41   :  { %v4716_v27 = vpop.f32.mrb[25].mxu1  ;;  %v5735_v28 = vpop.f32.mrb[28].mxu0  ;;  %v2976_v29 = vsel %vm283_vm6, %v2805_v26, -inf }
 0xe42   :  { %2977 = vmax.xlane.f32.xlu1 %v2976_v29  ;;  %2974 = vmax.xlane.f32.xlu0 %v2973_v30  ;;  %v4721_v31 = vpop.f32.mrb[29].mxu0  ;;  %v2979_v35 = vsel %vm283_vm6, %v5735_v28, -inf }
 0xe44   :  { %v2957_v32 = vpop.f32.mrb[26].mxu1 }
 0xe45   :  { %v4726_v33 = vpop.f32.mrb[27].mxu1  ;;  %v2982_v34 = vsel %vm283_vm6, %v2957_v32, -inf }
 0xe46   :  { %2983 = vmax.xlane.f32.xlu1 %v2982_v34  ;;  %2980 = vmax.xlane.f32.xlu0 %v2979_v35 }
 0xe57   :  { %3125 = vrot.lane.b32.xlu1 %v5637_v61, %s5165_s20 }
 0xe5b   :  { %3201 = vrot.lane.b32.xlu1 %v5661_v3, %s5165_s20 }
 0xe5c   :  { %3049 = vrot.lane.b32.xlu0 %v5639_v63, %s5165_s20 }
 0xe5d   :  { %v2963_v36 = vpop.xlane.xlu0 %2962 }
 0xe5e   :  { %v2985_v37 = vsub.f32 %v2425_v16, %v2963_v36 }
 0xe5f   :  { %3277 = vrot.lane.b32.xlu1 %v5657_v2, %s5165_s20 }
 0xe60   :  { %v2993_v38 = vmul.f32 1.442695, %v2985_v37 }
 0xe62   :  { %4970 = vpow2.f32 %v2993_v38 }
 0xe64   :  { %v2966_v39 = vpop.xlane.xlu1 %2965 }
 0xe65   :  { %v2986_v40 = vsub.f32 %v2501_v19, %v2966_v39 }
 0xe67   :  { %v2995_v41 = vmul.f32 1.442695, %v2986_v40 }
 0xe69   :  { %4972 = vpow2.f32 %v2995_v41 }
 0xe6c   :  { %v4971_v42 = vpop.eup %4970 }
 0xe6d   :  { %v3009_v43 = vsel %vm283_vm6, %v4971_v42, 0.0 }
 0xe73   :  { %v5752_v44 = vpop.eup %4972 }
 0xe74   :  { %v3012_v45 = vsel %vm283_vm6, %v5752_v44, 0.0 }
 0xe7b   :  { %3010 = vadd.xlane.f32.xlu0 %v3009_v43 }
 0xe83   :  { %3013 = vadd.xlane.f32.xlu1 %v3012_v45 }
 0xec7   :  { %v2972_v46 = vpop.xlane.xlu0 %2971 }
 0xec8   :  { %v2988_v48 = vsub.f32 %v2653_v21, %v2972_v46 }
 0xeca   :  { %v2999_v49 = vmul.f32 1.442695, %v2988_v48 }
 0xecb   :  { %v2969_v50 = vpop.xlane.xlu0 %2968 }
 0xecc   :  { %4974 = vpow2.f32 %v2999_v49  ;;  %v2987_v51 = vsub.f32 %v2577_v22, %v2969_v50  ;;  %v4371_v49 = vld [vmem:[%s5912_s3 + $0x28] sm:$0xff] }
 0xece   :  { %v2997_v52 = vmul.f32 1.442695, %v2987_v51 }
 0xecf   :  { %v2978_v53 = vpop.xlane.xlu1 %2977  ;;  %v2975_v57 = vpop.xlane.xlu0 %2974 }
 0xed0   :  { %4976 = vpow2.f32 %v2997_v52  ;;  %v2990_v9 = vsub.f32 %v2805_v26, %v2978_v53  ;;  %v2989_v10 = vsub.f32 %v5732_v25, %v2975_v57  ;;  %v4374_v53 = vld [vmem:[%s5912_s3 + $0x30] sm:$0xff] }
 0xed2   :  { %v3003_v11 = vmul.f32 1.442695, %v2990_v9  ;;  %v3001_v13 = vmul.f32 1.442695, %v2989_v10 }
 0xed3   :  { %v2984_v59 = vpop.xlane.xlu1 %2983  ;;  %v2981_v60 = vpop.xlane.xlu0 %2980 }
 0xed4   :  { %v2992_v12 = vsub.f32 %v2957_v32, %v2984_v59  ;;  %4978 = vpow2.f32 %v3003_v11  ;;  %v2991_v15 = vsub.f32 %v5735_v28, %v2981_v60 }
 0xed5   :  { %4980 = vpow2.f32 %v3001_v13  ;;  %v4370_v13 = vld [vmem:[#allocation5 + $0x1] ss:$0 sm:$0xff] }
 0xed6   :  { %v5756_v61 = vpop.eup %4974  ;;  %v3007_v0 = vmul.f32 1.442695, %v2992_v12  ;;  %v3005_v16 = vmul.f32 1.442695, %v2991_v15 }
 0xed7   :  { %v3126_v62 = vpop.permute.xlu1 %3125  ;;  %v3050_v63 = vpop.permute.xlu0 %3049  ;;  %v3018_v2 = vsel %vm283_vm6, %v5756_v61, 0.0 }
 0xed8   :  { %4733 = vmatpush3.msra.mxu1 %v3126_v62  ;;  %3019 = vadd.xlane.f32.xlu1 %v3018_v2  ;;  %4982 = vpow2.f32 %v3007_v0  ;;  %v4377_v62 = vld [vmem:[%s5912_s3 + $0x38] sm:$0xff] }
 0xed9   :  { %4728 = vmatpush3.msra.mxu0 %v3050_v63  ;;  %4742 = vmatprep.subr.mxu1 %v5159_v47  ;;  %4984 = vpow2.f32 %v3005_v16 }
 0xeda   :  { %v4977_v3 = vpop.eup %4976  ;;  %4737 = vmatprep.subr.mxu0 %v5159_v47 }
 0xedb   :  { %v3015_v54 = vsel %vm283_vm6, %v4977_v3, 0.0  ;;  %v3202_v17 = vpop.permute.xlu1 %3201 }
 0xedc   :  { %3016 = vadd.xlane.f32.xlu0 %v3015_v54 }
 0xee9   :  { %3429 = vrot.lane.b32.xlu1 %v5671_v6, %s5165_s20  ;;  %v4979_v6 = vpop.eup %4978 }
 0xeea   :  { %v5769_v19 = vpop.eup %4980  ;;  %v3024_v20 = vsel %vm283_vm6, %v4979_v6, 0.0 }
 0xeeb   :  { %v4983_v56 = vpop.eup %4982  ;;  %v3021_v7 = vsel %vm283_vm6, %v5769_v19, 0.0 }
 0xeec   :  { %v3030_v22 = vsel %vm283_vm6, %v4983_v56, 0.0  ;;  %v4985_v23 = vpop.eup %4984 }
 0xeed   :  { %v3027_v58 = vsel %vm283_vm6, %v4985_v23, 0.0 }
 0xef2   :  { %3353 = vrot.lane.b32.xlu0 %v5665_v4, %s5165_s20  ;;  %v3278_v4 = vpop.permute.xlu1 %3277 }
 0xf08   :  { %v3011_v18 = vpop.xlane.xlu0 %3010 }
 0xf09   :  { %4986 = vrcp.f32 %v3011_v18 }
 0xf0d   :  { %3025 = vadd.xlane.f32.xlu1 %v3024_v20 }
 0xf10   :  { %v3014_v21 = vpop.xlane.xlu1 %3013 }
 0xf11   :  { %4988 = vrcp.f32 %v3014_v21  ;;  %3031 = vadd.xlane.f32.xlu1 %v3030_v22  ;;  %3022 = vadd.xlane.f32.xlu0 %v3021_v7 }
 0xf13   :  { %v4987_v24 = vpop.eup %4986 }
 0xf14   :  { %v3041_v25 = vmul.f32 %v4987_v24, %v4971_v42 }
 0xf15   :  { %3028 = vadd.xlane.f32.xlu0 %v3027_v58  ;;  %v4384_v58 = vld [vmem:[%s5916_s7 + $0x20] sm:$0xff] }
 0xf16   :  { %4730 = vmatmul.mubr.msk.f32.vlgmr.msra.gmra.mrb[30].mxu0 %vm283_vm6, %v3041_v25 }
 0xf17   :  { %4738 = vmatpush3.msra.mxu0 %v3202_v17  ;;  %4739 = vmatprep.mubr.msk.f32.mxu0 %vm5160_vm5, %v5159_v47 }
 0xf18   :  { %4747 = vmatprep.subr.mxu0 %v5159_v47 }
 0xf1b   :  { %v4989_v55 = vpop.eup %4988 }
 0xf1c   :  { %v3042_v26 = vmul.f32 %v4989_v55, %v5752_v44  ;;  %v4367_v44 = vld [vmem:[%s5912_s3 + $0x20] sm:$0xff]  ;;  %v4385_v55 = vld [vmem:[%s5916_s7 + $0x28] sm:$0xff] }
 0xf1e   :  { %4735 = vmatmul.mubr.msk.f32.vlgmr.msra.gmra.mrb[28].mxu1 %vm283_vm6, %v3042_v26  ;;  %v4386_v26 = vld [vmem:[%s5916_s7 + $0x30] sm:$0xff] }
 0xf1f   :  { %4743 = vmatpush3.msra.mxu1 %v3278_v4  ;;  %4744 = vmatprep.mubr.msk.f32.mxu1 %vm5160_vm5, %v5159_v47 }
 0xf20   :  { %4752 = vmatprep.subr.mxu1 %v5159_v47 }
 0xf22   :  { %3581 = vrot.lane.b32.xlu1 %v5679_v8, %s5165_s20 }
 0xf2b   :  { %3505 = vrot.lane.b32.xlu0 %v5667_v5, %s5165_s20 }
 0xf65   :  { %v3020_v27 = vpop.xlane.xlu1 %3019 }
 0xf66   :  { %4990 = vrcp.f32 %v3020_v27  ;;  %v4857_v27 = vpack.c.bf16 %v4385_v55, %v4384_v58 }
 0xf69   :  { %v3017_v28 = vpop.xlane.xlu0 %3016  ;;  %v3430_v31 = vpop.permute.xlu1 %3429 }
 0xf6a   :  { %4992 = vrcp.f32 %v3017_v28  ;;  %v4387_v28 = vld [vmem:[%s5916_s7 + $0x38] sm:$0xff] }
 0xf6d   :  { %v3354_v8 = vpop.permute.xlu0 %3353 }
 0xf70   :  { %v4991_v29 = vpop.eup %4990 }
 0xf71   :  { %v3044_v30 = vmul.f32 %v4991_v29, %v5756_v61  ;;  %v4861_v29 = vpack.c.bf16 %v4387_v28, %v4386_v26 }
 0xf73   :  { %4745 = vmatmul.mubr.msk.f32.vlgmr.msra.gmra.mrb[30].mxu1 %vm283_vm6, %v3044_v30  ;;  %v4391_v30 = vld [vmem:[%s5918_s9 + $0x40] sm:$0xff] }
 0xf74   :  { %v4993_v32 = vpop.eup %4992  ;;  %4753 = vmatpush3.msra.mxu1 %v3430_v31  ;;  %4754 = vmatprep.mubr.msk.f32.mxu1 %vm5160_vm5, %v5159_v47  ;;  %v4392_v31 = vld [vmem:[%s5918_s9 + $0x48] sm:$0xff] }
 0xf75   :  { %v3043_v33 = vmul.f32 %v4993_v32, %v4977_v3  ;;  %4762 = vmatprep.subr.mxu1 %v5159_v47  ;;  %v4865_v32 = vpack.c.bf16 %v4392_v31, %v4391_v30 }
 0xf77   :  { %4740 = vmatmul.mubr.msk.f32.vlgmr.msra.gmra.mrb[32].mxu0 %vm283_vm6, %v3043_v33 }
 0xf78   :  { %4748 = vmatpush3.msra.mxu0 %v3354_v8  ;;  %4749 = vmatprep.mubr.msk.f32.mxu0 %vm5160_vm5, %v5159_v47 }
 0xf79   :  { %4757 = vmatprep.subr.mxu0 %v5159_v47 }
 0xf9a   :  { %v3026_v5 = vpop.xlane.xlu1 %3025 }
 0xf9b   :  { %4994 = vrcp.f32 %v3026_v5 }
 0xf9e   :  { %v3032_v34 = vpop.xlane.xlu1 %3031  ;;  %v3023_v35 = vpop.xlane.xlu0 %3022 }
 0xf9f   :  { %4996 = vrcp.f32 %v3032_v34 }
 0xfa0   :  { %4998 = vrcp.f32 %v3023_v35 }
 0xfa2   :  { %v3029_v36 = vpop.xlane.xlu0 %3028  ;;  %v3582_v39 = vpop.permute.xlu1 %3581 }
 0xfa3   :  { %5000 = vrcp.f32 %v3029_v36 }
 0xfa5   :  { %v4995_v37 = vpop.eup %4994 }
 0xfa6   :  { %v3046_v38 = vmul.f32 %v4995_v37, %v4979_v6  ;;  %v3506_v46 = vpop.permute.xlu0 %3505 }
 0xfa8   :  { %4755 = vmatmul.mubr.msk.f32.vlgmr.msra.gmra.mrb[32].mxu1 %vm283_vm6, %v3046_v38 }
 0xfa9   :  { %v4997_v40 = vpop.eup %4996  ;;  %4763 = vmatpush3.msra.mxu1 %v3582_v39  ;;  %4764 = vmatprep.mubr.msk.f32.mxu1 %vm5160_vm5, %v5159_v47 }
 0xfaa   :  { %v4999_v41 = vpop.eup %4998  ;;  %v3048_v42 = vmul.f32 %v4997_v40, %v4983_v56  ;;  %4858 = vmatprep.subr.bf16.mxu1 %v4857_v27 }
 0xfab   :  { %v3045_v43 = vmul.f32 %v4999_v41, %v5769_v19 }
 0xfac   :  { %4765 = vmatmul.mubr.msk.f32.vlgmr.msra.gmra.mrb[34].mxu1 %vm283_vm6, %v3048_v42 }
 0xfad   :  { %v5001_v45 = vpop.eup %5000  ;;  %4750 = vmatmul.mubr.msk.f32.vlgmr.msra.gmra.mrb[34].mxu0 %vm283_vm6, %v3045_v43  ;;  %4860 = vmatpush3.bf16.msra.mxu1 %v4857_v27 }
 0xfae   :  { %v3047_v48 = vmul.f32 %v5001_v45, %v4985_v23  ;;  %4758 = vmatpush3.msra.mxu0 %v3506_v46  ;;  %4759 = vmatprep.mubr.msk.f32.mxu0 %vm5160_vm5, %v5159_v47 }
 0xfaf   :  { %4767 = vmatprep.subr.mxu0 %v4367_v44  ;;  %4862 = vmatprep.subr.bf16.mxu1 %v4861_v29 }
 0xfb1   :  { %4760 = vmatmul.mubr.msk.f32.vlgmr.msra.gmra.mrb[36].mxu0 %vm283_vm6, %v3047_v48  ;;  %4864 = vmatpush3.bf16.msra.mxu1 %v4861_v29  ;;  %v4382_v48 = vld [vmem:[%s5920_s11 + $0x1] ss:$0 sm:$0xff] }
 0xfb2   :  { %4768 = vmatpush3.msra.mxu0 %v4367_v44  ;;  %4866 = vmatprep.subr.bf16.mxu1 %v4865_v32 }
 0xfb3   :  { %4772 = vmatprep.subr.mxu0 %v4371_v49 }
 0xfe9   :  { %v3121_v50 = vpop.f32.mrb[30].mxu0 }
 0xfea   :  { %v4731_v51 = vpop.f32.mrb[31].mxu0  ;;  %4769 = vmatprep.mubr.msk.f32.mxu0 %vm283_vm6, %v3121_v50 }
 0xfeb   :  { %v4383_v51 = vld [vmem:[%s5921_s12 + $0x1] ss:$0 sm:$0xff] }
 0xff1   :  { %v3197_v52 = vpop.f32.mrb[28].mxu1 }
 0xff2   :  { %v4736_v57 = vpop.f32.mrb[29].mxu1  ;;  %4770 = vmatmul.mubr.msk.f32.vlgmr.msra.gmra.mrb[38].mxu0 %vm283_vm6, %v3197_v52 }
 0xff3   :  { %4773 = vmatpush3.msra.mxu0 %v4371_v49 }
 0xff4   :  { %4777 = vmatprep.subr.mxu0 %v4374_v53 }
0x1046   :  { %v3349_v47 = vpop.f32.mrb[30].mxu1 }
0x1047   :  { %v4746_v59 = vpop.f32.mrb[31].mxu1 }
0x1048   :  { %v4393_v59 = vld [vmem:[%s5918_s9 + $0x50] sm:$0xff] }
0x104a   :  { %v3273_v60 = vpop.f32.mrb[32].mxu0 }
0x104b   :  { %v4741_v61 = vpop.f32.mrb[33].mxu0  ;;  %4774 = vmatprep.mubr.msk.f32.mxu0 %vm283_vm6, %v3273_v60  ;;  %v4394_v60 = vld [vmem:[%s5918_s9 + $0x58] sm:$0xff] }
0x104c   :  { %4775 = vmatmul.mubr.msk.f32.vlgmr.msra.gmra.mrb[38].mxu0 %vm283_vm6, %v3349_v47 }
0x104d   :  { %4778 = vmatpush3.msra.mxu0 %v4374_v53 }
0x104e   :  { %4782 = vmatprep.subr.mxu0 %v4377_v62 }
0x107b   :  { %v3501_v63 = vpop.f32.mrb[32].mxu1 }
0x107c   :  { %v4756_v2 = vpop.f32.mrb[33].mxu1 }
0x107d   :  { %v4395_v2 = vld [vmem:[%s5918_s9 + $0x60] sm:$0xff] }
0x107f   :  { %v3653_v3 = vpop.f32.mrb[34].mxu1 }
0x1080   :  { %v3425_v54 = vpop.f32.mrb[34].mxu0  ;;  %v4766_v9 = vpop.f32.mrb[35].mxu1 }
0x1081   :  { %v4751_v10 = vpop.f32.mrb[35].mxu0  ;;  %4779 = vmatprep.mubr.msk.f32.mxu0 %vm283_vm6, %v3425_v54  ;;  %v4397_v9 = vld [vmem:[%s5918_s9 + $0x70] sm:$0xff] }
0x1082   :  { %4780 = vmatmul.mubr.msk.f32.vlgmr.msra.gmra.mrb[38].mxu0 %vm283_vm6, %v3501_v63  ;;  %v4869_v63 = vpack.c.bf16 %v4394_v60, %v4393_v59  ;;  %v4398_v10 = vld [vmem:[%s5918_s9 + $0x78] sm:$0xff] }
0x1083   :  { %4783 = vmatpush3.msra.mxu0 %v4377_v62 }
0x1084   :  { %v3577_v11 = vpop.f32.mrb[36].mxu0 }
0x1085   :  { %v4761_v12 = vpop.f32.mrb[37].mxu0  ;;  %4784 = vmatprep.mubr.msk.f32.mxu0 %vm283_vm6, %v3577_v11  ;;  %v4877_v11 = vpack.c.bf16 %v4398_v10, %v4397_v9 }
0x1086   :  { %v4388_v12 = vld [vmem:[#allocation10 + $0x1] ss:$0 sm:$0xff] }
0x108a   :  { %4785 = vmatmul.mubr.msk.f32.vlgmr.msra.gmra.mrb[38].mxu0 %vm283_vm6, %v3653_v3  ;;  %v4396_v3 = vld [vmem:[%s5918_s9 + $0x68] sm:$0xff]  ;;  %s5166_s9 = smov [#allocation11]  }
0x108b   :  { %v4873_v54 = vpack.c.bf16 %v4396_v3, %v4395_v2  ;;  %s4270_s19 = sshll.u32 %s5166_s9, 4  ;;  %s4271_s19 = int_to_ptr.vmem [resolvable:$true] %s4270_s19 }
0x108c   :  { %s5120_s17 = scalar_lea.vmem %s4271_s19, 256  ;;  %p5125_p13 = scmp.lt.s32.totalorder %s4271_s19, %s4271_s19 }
0x108d   :  { %p5121_p12 = scmp.ne.s32.totalorder %s4271_s19, %s5120_s17  ;;  %p5126_p0 = scmp.lt.s32.totalorder %s5120_s17, %s5120_s17 }
0x108f   :  { %p5127_p1 = por %p5126_p0, %p5125_p13 }
0x1091   :  { %p5128_p2 = pnand %p5127_p1, %p5121_p12 }
0x115d   :  { %v4786_v0 = vpop.f32.mrb[38].mxu0 }
0x115e   :  { %v4883_v15 = vadd.f32 %v4786_v0, %v4370_v13  ;;  %v3994_v16 = vpop.f32.mrb[39].mxu0 }
0x115f   :  { %v4884_v17 = vadd.f32 %v4370_v13, %v3994_v16 }
0x1160   :  { %v5828_v18 = vadd.f32 %v4883_v15, %v5604_v1 }
0x1161   :  { %v5831_v6 = vadd.f32 %v4884_v17, %v5607_v14 }
0x1162   :  { %v4014_v19 = vsel %vm117_vm0, %v5828_v18, 0.0 }
0x1163   :  { %4015 = vadd.xlane.f32.xlu1 %v4014_v19  ;;  %v4011_v4 = vsel %vm117_vm0, %v5831_v6, 0.0 }
0x1164   :  { %4012 = vadd.xlane.f32.xlu0 %v4011_v4  ;;  %v4400_v4 = vld [vmem:[%s5919_s10 + $0x1] ss:$0 sm:$0xff] }
0x11f0   :  { %v4016_v20 = vpop.xlane.xlu1 %4015 }
0x11f1   :  { %v4018_v56 = vmul.f32 0.03125, %v4016_v20  ;;  %v4013_v21 = vpop.xlane.xlu0 %4012 }
0x11f2   :  { %v4017_v22 = vmul.f32 0.03125, %v4013_v21 }
0x11f3   :  { %v4020_v7 = vsub.f32 %v5828_v18, %v4018_v56 }
0x11f4   :  { %v4019_v1 = vsub.f32 %v5831_v6, %v4017_v22 }
0x11f5   :  { %v4022_v24 = vmul.f32 %v4020_v7, %v4020_v7  ;;  %v4056_v53 = vmul.f32 %v4382_v48, %v4020_v7 }
0x11f6   :  { %v4021_v23 = vmul.f32 %v4019_v1, %v4019_v1  ;;  %v4055_v49 = vmul.f32 %v4382_v48, %v4019_v1 }
0x11f7   :  { %v4026_v25 = vsel %vm117_vm0, %v4022_v24, 0.0 }
0x11f8   :  { %v4023_v14 = vsel %vm117_vm0, %v4021_v23, 0.0 }
0x11f9   :  { %4024 = vadd.xlane.f32.xlu0 %v4023_v14 }
0x11fd   :  { %4027 = vadd.xlane.f32.xlu0 %v4026_v25 }
0x1286   :  { %v4025_v33 = vpop.xlane.xlu0 %4024 }
0x1287   :  { %v4029_v8 = vmul.f32 0.03125, %v4025_v33 }
0x1289   :  { %5002 = vrsqrt.f32 %v4029_v8  ;;  %vm4033_vm1 = vcmp.eq.f32.partialorder %v4029_v8, inf  ;;  %v4036_v37 = vand.u32 2147483648, %v4029_v8  ;;  %vm4035_vm2 = vcmp.eq.f32.partialorder %v4029_v8, 0.0 }
0x128a   :  { %v4028_v5 = vpop.xlane.xlu0 %4027 }
0x128b   :  { %v4030_v34 = vmul.f32 0.03125, %v4028_v5 }
0x128d   :  { %5004 = vrsqrt.f32 %v4030_v34  ;;  %vm4040_vm3 = vcmp.eq.f32.partialorder %v4030_v34, inf  ;;  %v4043_v43 = vand.u32 2147483648, %v4030_v34  ;;  %vm4042_vm4 = vcmp.eq.f32.partialorder %v4030_v34, 0.0 }
0x1293   :  { %v5003_v35 = vpop.eup %5002 }
0x1294   :  { %v4032_v36 = vmul.f32 %v5003_v35, %v4029_v8 }
0x1296   :  { %v4034_v38 = vsel %vm4033_vm1, %v4029_v8, %v4032_v36 }
0x1297   :  { %v5005_v39 = vpop.eup %5004  ;;  %v4037_v40 = vsel %vm4035_vm2, %v4036_v37, %v4034_v38 }
0x1298   :  { %v4039_v41 = vmul.f32 %v5005_v39, %v4030_v34  ;;  %v4045_v42 = vadd.f32 1e-06, %v4037_v40 }
0x129a   :  { %v4041_v44 = vsel %vm4040_vm3, %v4030_v34, %v4039_v41  ;;  %5006 = vrcp.f32 %v4045_v42 }
0x129b   :  { %v4044_v45 = vsel %vm4042_vm4, %v4043_v43, %v4041_v44 }
0x129c   :  { %v4046_v46 = vadd.f32 1e-06, %v4044_v45 }
0x129e   :  { %5008 = vrcp.f32 %v4046_v46 }
0x12a4   :  { %v5007_v50 = vpop.eup %5006 }
0x12a5   :  { %v4057_v52 = vmul.f32 %v5007_v50, %v4055_v49 }
0x12a7   :  { %v4065_v57 = vadd.f32 %v4383_v51, %v4057_v52 }
0x12a8   :  { %v5009_v47 = vpop.eup %5008 }
0x12a9   :  { %v4058_v61 = vmul.f32 %v5009_v47, %v4056_v53  ;;  %4795 = vmatprep.mubr.msk.f32.mxu1 %vm117_vm0, %v4065_v57 }
0x12ab   :  { %v4066_v62 = vadd.f32 %v4383_v51, %v4058_v61 }
0x12ad   :  { %4796 = vmatmul.mubr.msk.f32.vlgmr.msra.gmra.mrb[36].mxu1 %vm117_vm0, %v4066_v62 }
0x12ae   :  { %4868 = vmatpush3.bf16.msra.mxu1 %v4865_v32 }
0x12af   :  { %4870 = vmatprep.subr.bf16.mxu1 %v4869_v63 }
0x12b2   :  { %4872 = vmatpush3.bf16.msra.mxu1 %v4869_v63 }
0x12b3   :  { %4874 = vmatprep.subr.bf16.mxu1 %v4873_v54 }
0x12b6   :  { %4876 = vmatpush3.bf16.msra.mxu1 %v4873_v54 }
0x12b7   :  { %4878 = vmatprep.subr.bf16.mxu1 %v4877_v11 }
0x12ba   :  { %4880 = vmatpush3.bf16.msra.mxu1 %v4877_v11 }
0x1380   :  { %v4797_v13 = vpop.f32.mrb[36].mxu1 }
0x1381   :  { %v4158_v0 = vadd.f32 %v4797_v13, %v4388_v12  ;;  %v4152_v15 = vpop.f32.mrb[37].mxu1 }
0x1382   :  { %v4153_v16 = vadd.f32 %v4388_v12, %v4152_v15 }
0x1383   :  { %v4162_v19 = vmax.f32 %v4158_v0, 0.0 }
0x1384   :  { %v4161_v17 = vmax.f32 %v4153_v16, 0.0 }
0x1386   :  { %4814 = vmatprep.mubr.msk.f32.mxu1 %vm2101_vm11, %v4161_v17 }
0x1387   :  { %4815 = vmatmul.mubr.msk.f32.vlgmr.msra.gmra.mrb[38].mxu1 %vm2101_vm11, %v4162_v19 }
0x145a   :  { %v4816_v20 = vpop.f32.mrb[38].mxu1 }
0x145b   :  { %v4258_v56 = vadd.f32 %v4816_v20, %v4400_v4  ;;  %v4252_v21 = vpop.f32.mrb[39].mxu1 }
0x145c   :  { %v4253_v22 = vadd.f32 %v4400_v4, %v4252_v21 }
0x145d   :  { %v4262_v7 = vadd.f32 %v4258_v56, %v5828_v18 }
0x145e   :  { %v4261_v1 = vadd.f32 %v4253_v22, %v5831_v6 }
0x145f   :  { %4264 = vst.msk [vmem:[#allocation11 + $0x8] sm:$0xff] %vm117_vm0, %v4262_v7 }
0x1460   :  { %4263 = vst.msk [vmem:[#allocation11] sm:$0xff] %vm117_vm0, %v4261_v1 }
0x1461   :  { %5131 = shalt.err (!%p5128_p2)
}
0x1462   :  { %s5132_s28 = scalar_lea.hbm %s5922_s13, 256 }
0x1463   :  { %p5133_p3 = scmp.ne.s32.totalorder %s5922_s13, %s5132_s28  ;;  %p5136_p4 = scmp.lt.u32.totalorder %s5132_s28, %s5922_s13 }
0x1465   :  { %p5138_p5 = pnand %p5136_p4, %p5133_p3 }
0x1467   :  { %5141 = shalt.err (!%p5138_p5)
}
0x1468   :  { %4276 = dma.vmem_to_hbm [thread:$0]  %s4271_s19, 256, %s5922_s13, [#allocation4], %s5155_s6, %s5155_s6, %s5156_s23  }
0x1469   :  { %5148 = dma.done.wait [#allocation4], 256  }
0x146a   :  { %5149 = vsyncadd [#allocation4], 4294967040 }
0x146b   :  { %4280 = vsyncpa [#allocation3], 1 }
0x146c   :  { %4281 = vsyncpa [#allocation6], 1 }
0x146d   :  { %4282 = vsyncpa [#allocation9], 1 }
0x146e   :  { %4283 = vsyncpa [#allocation4], 1 }

</bundles_post_ra>
